<compile_context>
chip_gen: v5e
topology: v5e:2x2
jax: 0.10.0
libtpu: 0.0.40
codegen_flags: <defaults>
</compile_context>

<pallas_src>
import jax
import jax.numpy as jnp
from jax.experimental import pallas as pl
from jax.experimental.pallas import tpu as pltpu

NET_DEPTH = 8
SKIP_LAYER = 4


# ---------------------------------------------------------------------------
# Parameter construction (deterministic, mirrors MLP.__init__ / initialize())
# ---------------------------------------------------------------------------
def _xavier_uniform(key, fan_in, fan_out, dtype=jnp.float32):
    bound = (6.0 / (fan_in + fan_out)) ** 0.5
    return jax.random.uniform(key, (fan_in, fan_out), dtype, -bound, bound)


def init_mlp_params(key, input_dim, output_dim, net_width):
    keys = jax.random.split(key, NET_DEPTH + 1)
    ws, bs = [], []
    in_f = input_dim
    for i in range(NET_DEPTH):
        ws.append(_xavier_uniform(keys[i], in_f, net_width))
        bs.append(jnp.zeros((1, net_width), jnp.float32))
        if i % SKIP_LAYER == 0 and i > 0:
            in_f = net_width + input_dim
        else:
            in_f = net_width
    wo = _xavier_uniform(keys[-1], in_f, output_dim)
    bo = jnp.zeros((1, output_dim), jnp.float32)
    return ws, bs, wo, bo


def prepare_mlp_weights(ws, bs, wo, bo):
    """One-time weight prep (hoisted off the hot path).

    * Split the layer-5 weight (net_width + input_dim, net_width) into its
      h-part (w5a) and input-part (w5b)  — matches cat([h, inputs]) order.
    * Fuse the two K=input_dim dots: wcat = [w0 | w5b] -> (input_dim, 2*W).
    * Cast all matmul weights to bf16 (MXU-native); biases stay f32.
    """
    net_width = ws[0].shape[1]
    w5 = ws[SKIP_LAYER + 1]
    w5a, w5b = w5[:net_width, :], w5[net_width:, :]
    wcat = jnp.concatenate([ws[0], w5b], axis=1)          # (input_dim, 2*W)
    weights = tuple(
        w.astype(jnp.bfloat16)
        for w in (wcat, ws[1], ws[2], ws[3], ws[4], w5a, ws[6], ws[7], wo))
    biases = tuple(b.astype(jnp.float32) for b in (*bs, bo))
    return weights, biases


# ---------------------------------------------------------------------------
# Pallas kernel: whole 8-layer MLP + skip + output head for one row-tile.
# Weights arrive bf16; activations carried bf16, accumulation in f32.
# ---------------------------------------------------------------------------
def mlp_kernel(*refs):
    (x_ref,
     wcat, w1, w2, w3, w4, w5a, w6, w7, wo,
     b0, b1, b2, b3, b4, b5, b6, b7, bo,
     o_ref) = refs

    net_width = b0.shape[-1]

    # Fused shallow-K matmul: lanes [0, W) = layer-0 preactivation,
    # lanes [W, 2W) = inputs @ W5b, the skip contribution used at layer 5.
    x_bf = x_ref[...].astype(jnp.bfloat16)
    xcat = jnp.dot(x_bf, wcat[...], preferred_element_type=jnp.float32)
    skip = xcat[:, net_width:]                      # f32, held until layer 5

    def dense(h_bf16, w_ref, b_ref):
        # bf16 MXU operands, f32 accumulation; bias-add / ReLU stay f32 (VPU).
        return jnp.dot(h_bf16, w_ref[...],
                       preferred_element_type=jnp.float32) + b_ref[...]

    # layer 0
    h = jnp.maximum(xcat[:, :net_width] + b0[...], 0.0).astype(jnp.bfloat16)

    # layers 1..4
    for w, b in ((w1, b1), (w2, b2), (w3, b3), (w4, b4)):
        h = jnp.maximum(dense(h, w, b), 0.0).astype(jnp.bfloat16)

    # layer 5: Linear(cat([h, inputs])) == h @ W5a + inputs @ W5b + b5
    h = jnp.maximum(
        jnp.dot(h, w5a[...], preferred_element_type=jnp.float32)
        + skip + b5[...], 0.0).astype(jnp.bfloat16)

    # layers 6..7
    for w, b in ((w6, b6), (w7, b7)):
        h = jnp.maximum(dense(h, w, b), 0.0).astype(jnp.bfloat16)

    # output head: compact (tm, output_dim) store — tiny HBM writeback.
    o_ref[...] = dense(h, wo, bo).astype(o_ref.dtype)


def mlp_pallas(x, weights, biases, *, tm=None):
    N, input_dim = x.shape
    output_dim = weights[-1].shape[1]

    if tm is None:
        # Big tiles amortize ~0.35 us per-step pipeline overhead, but keep the
        # grid >= 4 steps so v7x's two TensorCores each get >= 2 steps.
        tm = 256
        for cand in (512, 1024, 2048):
            if N >= 4 * cand:
                tm = cand
    tm = max(8, min(tm, -(-N // 8) * 8))   # no point in a tile larger than N

    grid = (pl.cdiv(N, tm),)               # ragged last block: writes masked

    def const_spec(a):
        # Whole-array block, constant index map: Mosaic skips the re-DMA when
        # the block index is unchanged, so weights/biases are fetched once.
        # TODO(synk): pipeline_mode=pl.Buffered(1) would drop their double
        # buffers (~0.3 MiB) — only matters for very wide nets on v7x.
        return pl.BlockSpec(a.shape, lambda i: (0, 0))

    in_specs = ([pl.BlockSpec((tm, input_dim), lambda i: (i, 0))]
                + [const_spec(w) for w in weights]
                + [const_spec(b) for b in biases])

    grid_spec = pltpu.PrefetchScalarGridSpec(
        num_scalar_prefetch=0,
        grid=grid,
        in_specs=in_specs,
        out_specs=pl.BlockSpec((tm, output_dim), lambda i: (i, 0)),
    )

    return pl.pallas_call(
        mlp_kernel,
        out_shape=jax.ShapeDtypeStruct((N, output_dim), jnp.float32),
        grid_spec=grid_spec,
        compiler_params=pltpu.CompilerParams(
            dimension_semantics=("parallel",)),
    )(x, *weights, *biases)


# ---------------------------------------------------------------------------
# Pure-JAX f32 reference (mirrors MLP.forward exactly)
# ---------------------------------------------------------------------------
def mlp_ref(x, ws, bs, wo, bo):
    inputs = x
    h = x
    for i in range(NET_DEPTH):
        h = jnp.maximum(h @ ws[i] + bs[i], 0.0)
        if i % SKIP_LAYER == 0 and i > 0:
            h = jnp.concatenate([h, inputs], axis=-1)
    return h @ wo + bo


if __name__ == "__main__":
    key = jax.random.PRNGKey(0)
    k_param, k_x = jax.random.split(key)

    input_dim, output_dim, net_width = 16, 8, 128
    N = 1000  # not a multiple of tm: exercises the ragged (masked) last block

    ws, bs, wo, bo = init_mlp_params(k_param, input_dim, output_dim, net_width)
    x = jax.random.normal(k_x, (N, input_dim), jnp.float32)

    # Weight prep runs once and is reused across calls (off the hot path).
    weights, biases = prepare_mlp_weights(ws, bs, wo, bo)

    out = mlp_pallas(x, weights, biases)
    out = jax.block_until_ready(out)

    ref = mlp_ref(x, ws, bs, wo, bo)
    assert out.shape == (N, output_dim)
    # bf16 matmul operands / bf16-carried activations with f32 accumulation:
    # ~1e-2-level relative error vs the f32 reference is expected and benign.
    assert jnp.allclose(out, ref, atol=3e-2, rtol=3e-2)

    print("KERNEL_OK")
</pallas_src>

<mosaic_0001>
module attributes {stable_mosaic.version = 11 : i64} {
  func.func @mlp_kernel(%arg0: i32, %arg1: memref<256x16xf32, #tpu.memory_space<vmem>>, %arg2: memref<16x256xbf16, #tpu.memory_space<vmem>>, %arg3: memref<128x128xbf16, #tpu.memory_space<vmem>>, %arg4: memref<128x128xbf16, #tpu.memory_space<vmem>>, %arg5: memref<128x128xbf16, #tpu.memory_space<vmem>>, %arg6: memref<128x128xbf16, #tpu.memory_space<vmem>>, %arg7: memref<128x128xbf16, #tpu.memory_space<vmem>>, %arg8: memref<128x128xbf16, #tpu.memory_space<vmem>>, %arg9: memref<128x128xbf16, #tpu.memory_space<vmem>>, %arg10: memref<128x8xbf16, #tpu.memory_space<vmem>>, %arg11: memref<1x128xf32, #tpu.memory_space<vmem>>, %arg12: memref<1x128xf32, #tpu.memory_space<vmem>>, %arg13: memref<1x128xf32, #tpu.memory_space<vmem>>, %arg14: memref<1x128xf32, #tpu.memory_space<vmem>>, %arg15: memref<1x128xf32, #tpu.memory_space<vmem>>, %arg16: memref<1x128xf32, #tpu.memory_space<vmem>>, %arg17: memref<1x128xf32, #tpu.memory_space<vmem>>, %arg18: memref<1x128xf32, #tpu.memory_space<vmem>>, %arg19: memref<1x8xf32, #tpu.memory_space<vmem>>, %arg20: memref<256x8xf32, #tpu.memory_space<vmem>>) attributes {dimension_semantics = [#tpu.dimension_semantics<parallel>], iteration_bounds = array<i64: 4>, scalar_prefetch = 0 : i64, scratch_operands = 0 : i64, tpu.core_type = #tpu.core_type<tc>, window_params = [{transform_indices = @transform_0, window_bounds = array<i64: 256, 16>}, {pipeline_mode = #tpu.pipeline_mode<synchronous>, transform_indices = @transform_1, window_bounds = array<i64: 16, 256>}, {pipeline_mode = #tpu.pipeline_mode<synchronous>, transform_indices = @transform_2, window_bounds = array<i64: 128, 128>}, {pipeline_mode = #tpu.pipeline_mode<synchronous>, transform_indices = @transform_3, window_bounds = array<i64: 128, 128>}, {pipeline_mode = #tpu.pipeline_mode<synchronous>, transform_indices = @transform_4, window_bounds = array<i64: 128, 128>}, {pipeline_mode = #tpu.pipeline_mode<synchronous>, transform_indices = @transform_5, window_bounds = array<i64: 128, 128>}, {pipeline_mode = #tpu.pipeline_mode<synchronous>, transform_indices = @transform_6, window_bounds = array<i64: 128, 128>}, {pipeline_mode = #tpu.pipeline_mode<synchronous>, transform_indices = @transform_7, window_bounds = array<i64: 128, 128>}, {pipeline_mode = #tpu.pipeline_mode<synchronous>, transform_indices = @transform_8, window_bounds = array<i64: 128, 128>}, {pipeline_mode = #tpu.pipeline_mode<synchronous>, transform_indices = @transform_9, window_bounds = array<i64: 128, 8>}, {pipeline_mode = #tpu.pipeline_mode<synchronous>, transform_indices = @transform_10, window_bounds = array<i64: 1, 128>}, {pipeline_mode = #tpu.pipeline_mode<synchronous>, transform_indices = @transform_11, window_bounds = array<i64: 1, 128>}, {pipeline_mode = #tpu.pipeline_mode<synchronous>, transform_indices = @transform_12, window_bounds = array<i64: 1, 128>}, {pipeline_mode = #tpu.pipeline_mode<synchronous>, transform_indices = @transform_13, window_bounds = array<i64: 1, 128>}, {pipeline_mode = #tpu.pipeline_mode<synchronous>, transform_indices = @transform_14, window_bounds = array<i64: 1, 128>}, {pipeline_mode = #tpu.pipeline_mode<synchronous>, transform_indices = @transform_15, window_bounds = array<i64: 1, 128>}, {pipeline_mode = #tpu.pipeline_mode<synchronous>, transform_indices = @transform_16, window_bounds = array<i64: 1, 128>}, {pipeline_mode = #tpu.pipeline_mode<synchronous>, transform_indices = @transform_17, window_bounds = array<i64: 1, 128>}, {pipeline_mode = #tpu.pipeline_mode<synchronous>, transform_indices = @transform_18, window_bounds = array<i64: 1, 8>}, {transform_indices = @transform_19, window_bounds = array<i64: 256, 8>}]} {
    %c0 = arith.constant 0 : index
    %c0_0 = arith.constant 0 : index
    %0 = vector.load %arg1[%c0, %c0_0] : memref<256x16xf32, #tpu.memory_space<vmem>>, vector<256x16xf32>
    %1 = arith.truncf %0 : vector<256x16xf32> to vector<256x16xbf16>
    %c0_1 = arith.constant 0 : index
    %c0_2 = arith.constant 0 : index
    %2 = vector.load %arg2[%c0_1, %c0_2] : memref<16x256xbf16, #tpu.memory_space<vmem>>, vector<16x256xbf16>
    %cst = arith.constant dense<0.000000e+00> : vector<256x256xf32>
    %3 = tpu.matmul %1, %2, %cst {dimension_numbers = #tpu.dot_dimension_numbers<[1], [0], [0], [1], [0, 0, 1, 1], [], []>} : vector<256x16xbf16>, vector<16x256xbf16>, vector<256x256xf32> -> vector<256x256xf32>
    %4 = vector.extract_strided_slice %3 {offsets = [0, 128], sizes = [256, 128], strides = [1, 1]} : vector<256x256xf32> to vector<256x128xf32>
    %5 = vector.extract_strided_slice %3 {offsets = [0, 0], sizes = [256, 128], strides = [1, 1]} : vector<256x256xf32> to vector<256x128xf32>
    %c0_3 = arith.constant 0 : index
    %c0_4 = arith.constant 0 : index
    %6 = vector.load %arg11[%c0_3, %c0_4] : memref<1x128xf32, #tpu.memory_space<vmem>>, vector<1x128xf32>
    %7 = vector.broadcast %6 : vector<1x128xf32> to vector<256x128xf32>
    %8 = arith.addf %5, %7 : vector<256x128xf32>
    %cst_5 = arith.constant 0.000000e+00 : f32
    %9 = vector.broadcast %cst_5 : f32 to vector<256x128xf32>
    %10 = arith.maximumf %8, %9 : vector<256x128xf32>
    %11 = arith.truncf %10 : vector<256x128xf32> to vector<256x128xbf16>
    %c0_6 = arith.constant 0 : index
    %c0_7 = arith.constant 0 : index
    %12 = vector.load %arg3[%c0_6, %c0_7] : memref<128x128xbf16, #tpu.memory_space<vmem>>, vector<128x128xbf16>
    %cst_8 = arith.constant dense<0.000000e+00> : vector<256x128xf32>
    %13 = tpu.matmul %11, %12, %cst_8 {dimension_numbers = #tpu.dot_dimension_numbers<[1], [0], [0], [1], [0, 0, 1, 1], [], []>} : vector<256x128xbf16>, vector<128x128xbf16>, vector<256x128xf32> -> vector<256x128xf32>
    %c0_9 = arith.constant 0 : index
    %c0_10 = arith.constant 0 : index
    %14 = vector.load %arg12[%c0_9, %c0_10] : memref<1x128xf32, #tpu.memory_space<vmem>>, vector<1x128xf32>
    %15 = vector.broadcast %14 : vector<1x128xf32> to vector<256x128xf32>
    %16 = arith.addf %13, %15 : vector<256x128xf32>
    %cst_11 = arith.constant 0.000000e+00 : f32
    %17 = vector.broadcast %cst_11 : f32 to vector<256x128xf32>
    %18 = arith.maximumf %16, %17 : vector<256x128xf32>
    %19 = arith.truncf %18 : vector<256x128xf32> to vector<256x128xbf16>
    %c0_12 = arith.constant 0 : index
    %c0_13 = arith.constant 0 : index
    %20 = vector.load %arg4[%c0_12, %c0_13] : memref<128x128xbf16, #tpu.memory_space<vmem>>, vector<128x128xbf16>
    %cst_14 = arith.constant dense<0.000000e+00> : vector<256x128xf32>
    %21 = tpu.matmul %19, %20, %cst_14 {dimension_numbers = #tpu.dot_dimension_numbers<[1], [0], [0], [1], [0, 0, 1, 1], [], []>} : vector<256x128xbf16>, vector<128x128xbf16>, vector<256x128xf32> -> vector<256x128xf32>
    %c0_15 = arith.constant 0 : index
    %c0_16 = arith.constant 0 : index
    %22 = vector.load %arg13[%c0_15, %c0_16] : memref<1x128xf32, #tpu.memory_space<vmem>>, vector<1x128xf32>
    %23 = vector.broadcast %22 : vector<1x128xf32> to vector<256x128xf32>
    %24 = arith.addf %21, %23 : vector<256x128xf32>
    %cst_17 = arith.constant 0.000000e+00 : f32
    %25 = vector.broadcast %cst_17 : f32 to vector<256x128xf32>
    %26 = arith.maximumf %24, %25 : vector<256x128xf32>
    %27 = arith.truncf %26 : vector<256x128xf32> to vector<256x128xbf16>
    %c0_18 = arith.constant 0 : index
    %c0_19 = arith.constant 0 : index
    %28 = vector.load %arg5[%c0_18, %c0_19] : memref<128x128xbf16, #tpu.memory_space<vmem>>, vector<128x128xbf16>
    %cst_20 = arith.constant dense<0.000000e+00> : vector<256x128xf32>
    %29 = tpu.matmul %27, %28, %cst_20 {dimension_numbers = #tpu.dot_dimension_numbers<[1], [0], [0], [1], [0, 0, 1, 1], [], []>} : vector<256x128xbf16>, vector<128x128xbf16>, vector<256x128xf32> -> vector<256x128xf32>
    %c0_21 = arith.constant 0 : index
    %c0_22 = arith.constant 0 : index
    %30 = vector.load %arg14[%c0_21, %c0_22] : memref<1x128xf32, #tpu.memory_space<vmem>>, vector<1x128xf32>
    %31 = vector.broadcast %30 : vector<1x128xf32> to vector<256x128xf32>
    %32 = arith.addf %29, %31 : vector<256x128xf32>
    %cst_23 = arith.constant 0.000000e+00 : f32
    %33 = vector.broadcast %cst_23 : f32 to vector<256x128xf32>
    %34 = arith.maximumf %32, %33 : vector<256x128xf32>
    %35 = arith.truncf %34 : vector<256x128xf32> to vector<256x128xbf16>
    %c0_24 = arith.constant 0 : index
    %c0_25 = arith.constant 0 : index
    %36 = vector.load %arg6[%c0_24, %c0_25] : memref<128x128xbf16, #tpu.memory_space<vmem>>, vector<128x128xbf16>
    %cst_26 = arith.constant dense<0.000000e+00> : vector<256x128xf32>
    %37 = tpu.matmul %35, %36, %cst_26 {dimension_numbers = #tpu.dot_dimension_numbers<[1], [0], [0], [1], [0, 0, 1, 1], [], []>} : vector<256x128xbf16>, vector<128x128xbf16>, vector<256x128xf32> -> vector<256x128xf32>
    %c0_27 = arith.constant 0 : index
    %c0_28 = arith.constant 0 : index
    %38 = vector.load %arg15[%c0_27, %c0_28] : memref<1x128xf32, #tpu.memory_space<vmem>>, vector<1x128xf32>
    %39 = vector.broadcast %38 : vector<1x128xf32> to vector<256x128xf32>
    %40 = arith.addf %37, %39 : vector<256x128xf32>
    %cst_29 = arith.constant 0.000000e+00 : f32
    %41 = vector.broadcast %cst_29 : f32 to vector<256x128xf32>
    %42 = arith.maximumf %40, %41 : vector<256x128xf32>
    %43 = arith.truncf %42 : vector<256x128xf32> to vector<256x128xbf16>
    %c0_30 = arith.constant 0 : index
    %c0_31 = arith.constant 0 : index
    %44 = vector.load %arg7[%c0_30, %c0_31] : memref<128x128xbf16, #tpu.memory_space<vmem>>, vector<128x128xbf16>
    %cst_32 = arith.constant dense<0.000000e+00> : vector<256x128xf32>
    %45 = tpu.matmul %43, %44, %cst_32 {dimension_numbers = #tpu.dot_dimension_numbers<[1], [0], [0], [1], [0, 0, 1, 1], [], []>} : vector<256x128xbf16>, vector<128x128xbf16>, vector<256x128xf32> -> vector<256x128xf32>
    %46 = arith.addf %45, %4 : vector<256x128xf32>
    %c0_33 = arith.constant 0 : index
    %c0_34 = arith.constant 0 : index
    %47 = vector.load %arg16[%c0_33, %c0_34] : memref<1x128xf32, #tpu.memory_space<vmem>>, vector<1x128xf32>
    %48 = vector.broadcast %47 : vector<1x128xf32> to vector<256x128xf32>
    %49 = arith.addf %46, %48 : vector<256x128xf32>
    %cst_35 = arith.constant 0.000000e+00 : f32
    %50 = vector.broadcast %cst_35 : f32 to vector<256x128xf32>
    %51 = arith.maximumf %49, %50 : vector<256x128xf32>
    %52 = arith.truncf %51 : vector<256x128xf32> to vector<256x128xbf16>
    %c0_36 = arith.constant 0 : index
    %c0_37 = arith.constant 0 : index
    %53 = vector.load %arg8[%c0_36, %c0_37] : memref<128x128xbf16, #tpu.memory_space<vmem>>, vector<128x128xbf16>
    %cst_38 = arith.constant dense<0.000000e+00> : vector<256x128xf32>
    %54 = tpu.matmul %52, %53, %cst_38 {dimension_numbers = #tpu.dot_dimension_numbers<[1], [0], [0], [1], [0, 0, 1, 1], [], []>} : vector<256x128xbf16>, vector<128x128xbf16>, vector<256x128xf32> -> vector<256x128xf32>
    %c0_39 = arith.constant 0 : index
    %c0_40 = arith.constant 0 : index
    %55 = vector.load %arg17[%c0_39, %c0_40] : memref<1x128xf32, #tpu.memory_space<vmem>>, vector<1x128xf32>
    %56 = vector.broadcast %55 : vector<1x128xf32> to vector<256x128xf32>
    %57 = arith.addf %54, %56 : vector<256x128xf32>
    %cst_41 = arith.constant 0.000000e+00 : f32
    %58 = vector.broadcast %cst_41 : f32 to vector<256x128xf32>
    %59 = arith.maximumf %57, %58 : vector<256x128xf32>
    %60 = arith.truncf %59 : vector<256x128xf32> to vector<256x128xbf16>
    %c0_42 = arith.constant 0 : index
    %c0_43 = arith.constant 0 : index
    %61 = vector.load %arg9[%c0_42, %c0_43] : memref<128x128xbf16, #tpu.memory_space<vmem>>, vector<128x128xbf16>
    %cst_44 = arith.constant dense<0.000000e+00> : vector<256x128xf32>
    %62 = tpu.matmul %60, %61, %cst_44 {dimension_numbers = #tpu.dot_dimension_numbers<[1], [0], [0], [1], [0, 0, 1, 1], [], []>} : vector<256x128xbf16>, vector<128x128xbf16>, vector<256x128xf32> -> vector<256x128xf32>
    %c0_45 = arith.constant 0 : index
    %c0_46 = arith.constant 0 : index
    %63 = vector.load %arg18[%c0_45, %c0_46] : memref<1x128xf32, #tpu.memory_space<vmem>>, vector<1x128xf32>
    %64 = vector.broadcast %63 : vector<1x128xf32> to vector<256x128xf32>
    %65 = arith.addf %62, %64 : vector<256x128xf32>
    %cst_47 = arith.constant 0.000000e+00 : f32
    %66 = vector.broadcast %cst_47 : f32 to vector<256x128xf32>
    %67 = arith.maximumf %65, %66 : vector<256x128xf32>
    %68 = arith.truncf %67 : vector<256x128xf32> to vector<256x128xbf16>
    %c0_48 = arith.constant 0 : index
    %c0_49 = arith.constant 0 : index
    %69 = vector.load %arg10[%c0_48, %c0_49] : memref<128x8xbf16, #tpu.memory_space<vmem>>, vector<128x8xbf16>
    %cst_50 = arith.constant dense<0.000000e+00> : vector<256x8xf32>
    %70 = tpu.matmul %68, %69, %cst_50 {dimension_numbers = #tpu.dot_dimension_numbers<[1], [0], [0], [1], [0, 0, 1, 1], [], []>} : vector<256x128xbf16>, vector<128x8xbf16>, vector<256x8xf32> -> vector<256x8xf32>
    %c0_51 = arith.constant 0 : index
    %c0_52 = arith.constant 0 : index
    %71 = vector.load %arg19[%c0_51, %c0_52] : memref<1x8xf32, #tpu.memory_space<vmem>>, vector<1x8xf32>
    %72 = vector.broadcast %71 : vector<1x8xf32> to vector<256x8xf32>
    %73 = arith.addf %70, %72 : vector<256x8xf32>
    %c0_53 = arith.constant 0 : index
    %c0_54 = arith.constant 0 : index
    %74 = vector.load %arg20[%c0_53, %c0_54] : memref<256x8xf32, #tpu.memory_space<vmem>>, vector<256x8xf32>
    tpu.vector_store %arg20[%c0_53, %c0_54], %73 {strides = array<i32>} : memref<256x8xf32, #tpu.memory_space<vmem>>, vector<256x8xf32>,
    return
  }
  func.func @transform_0(%arg0: i32) -> (i32, i32) {
    %c0_i32 = arith.constant 0 : i32
    %c0_i32_0 = arith.constant 0 : i32
    return %arg0, %c0_i32 : i32, i32
  }
  func.func @transform_1(%arg0: i32) -> (i32, i32) {
    %c0_i32 = arith.constant 0 : i32
    %c0_i32_0 = arith.constant 0 : i32
    %c0_i32_1 = arith.constant 0 : i32
    return %c0_i32, %c0_i32_0 : i32, i32
  }
  func.func @transform_2(%arg0: i32) -> (i32, i32) {
    %c0_i32 = arith.constant 0 : i32
    %c0_i32_0 = arith.constant 0 : i32
    %c0_i32_1 = arith.constant 0 : i32
    return %c0_i32, %c0_i32_0 : i32, i32
  }
  func.func @transform_3(%arg0: i32) -> (i32, i32) {
    %c0_i32 = arith.constant 0 : i32
    %c0_i32_0 = arith.constant 0 : i32
    %c0_i32_1 = arith.constant 0 : i32
    return %c0_i32, %c0_i32_0 : i32, i32
  }
  func.func @transform_4(%arg0: i32) -> (i32, i32) {
    %c0_i32 = arith.constant 0 : i32
    %c0_i32_0 = arith.constant 0 : i32
    %c0_i32_1 = arith.constant 0 : i32
    return %c0_i32, %c0_i32_0 : i32, i32
  }
  func.func @transform_5(%arg0: i32) -> (i32, i32) {
    %c0_i32 = arith.constant 0 : i32
    %c0_i32_0 = arith.constant 0 : i32
    %c0_i32_1 = arith.constant 0 : i32
    return %c0_i32, %c0_i32_0 : i32, i32
  }
  func.func @transform_6(%arg0: i32) -> (i32, i32) {
    %c0_i32 = arith.constant 0 : i32
    %c0_i32_0 = arith.constant 0 : i32
    %c0_i32_1 = arith.constant 0 : i32
    return %c0_i32, %c0_i32_0 : i32, i32
  }
  func.func @transform_7(%arg0: i32) -> (i32, i32) {
    %c0_i32 = arith.constant 0 : i32
    %c0_i32_0 = arith.constant 0 : i32
    %c0_i32_1 = arith.constant 0 : i32
    return %c0_i32, %c0_i32_0 : i32, i32
  }
  func.func @transform_8(%arg0: i32) -> (i32, i32) {
    %c0_i32 = arith.constant 0 : i32
    %c0_i32_0 = arith.constant 0 : i32
    %c0_i32_1 = arith.constant 0 : i32
    return %c0_i32, %c0_i32_0 : i32, i32
  }
  func.func @transform_9(%arg0: i32) -> (i32, i32) {
    %c0_i32 = arith.constant 0 : i32
    %c0_i32_0 = arith.constant 0 : i32
    %c0_i32_1 = arith.constant 0 : i32
    return %c0_i32, %c0_i32_0 : i32, i32
  }
  func.func @transform_10(%arg0: i32) -> (i32, i32) {
    %c0_i32 = arith.constant 0 : i32
    %c0_i32_0 = arith.constant 0 : i32
    %c0_i32_1 = arith.constant 0 : i32
    return %c0_i32, %c0_i32_0 : i32, i32
  }
  func.func @transform_11(%arg0: i32) -> (i32, i32) {
    %c0_i32 = arith.constant 0 : i32
    %c0_i32_0 = arith.constant 0 : i32
    %c0_i32_1 = arith.constant 0 : i32
    return %c0_i32, %c0_i32_0 : i32, i32
  }
  func.func @transform_12(%arg0: i32) -> (i32, i32) {
    %c0_i32 = arith.constant 0 : i32
    %c0_i32_0 = arith.constant 0 : i32
    %c0_i32_1 = arith.constant 0 : i32
    return %c0_i32, %c0_i32_0 : i32, i32
  }
  func.func @transform_13(%arg0: i32) -> (i32, i32) {
    %c0_i32 = arith.constant 0 : i32
    %c0_i32_0 = arith.constant 0 : i32
    %c0_i32_1 = arith.constant 0 : i32
    return %c0_i32, %c0_i32_0 : i32, i32
  }
  func.func @transform_14(%arg0: i32) -> (i32, i32) {
    %c0_i32 = arith.constant 0 : i32
    %c0_i32_0 = arith.constant 0 : i32
    %c0_i32_1 = arith.constant 0 : i32
    return %c0_i32, %c0_i32_0 : i32, i32
  }
  func.func @transform_15(%arg0: i32) -> (i32, i32) {
    %c0_i32 = arith.constant 0 : i32
    %c0_i32_0 = arith.constant 0 : i32
    %c0_i32_1 = arith.constant 0 : i32
    return %c0_i32, %c0_i32_0 : i32, i32
  }
  func.func @transform_16(%arg0: i32) -> (i32, i32) {
    %c0_i32 = arith.constant 0 : i32
    %c0_i32_0 = arith.constant 0 : i32
    %c0_i32_1 = arith.constant 0 : i32
    return %c0_i32, %c0_i32_0 : i32, i32
  }
  func.func @transform_17(%arg0: i32) -> (i32, i32) {
    %c0_i32 = arith.constant 0 : i32
    %c0_i32_0 = arith.constant 0 : i32
    %c0_i32_1 = arith.constant 0 : i32
    return %c0_i32, %c0_i32_0 : i32, i32
  }
  func.func @transform_18(%arg0: i32) -> (i32, i32) {
    %c0_i32 = arith.constant 0 : i32
    %c0_i32_0 = arith.constant 0 : i32
    %c0_i32_1 = arith.constant 0 : i32
    return %c0_i32, %c0_i32_0 : i32, i32
  }
  func.func @transform_19(%arg0: i32) -> (i32, i32) {
    %c0_i32 = arith.constant 0 : i32
    %c0_i32_0 = arith.constant 0 : i32
    return %arg0, %c0_i32 : i32, i32
  }
}

</mosaic_0001>

<bundles_post_ra>
// kernel: tpu_custom_call.1
= control target key start
LH: loop header
LB: loop body
LE: loop exit
PB: predicated region body
PF: predicated region fallthrough
CT: control target
= control target key end

     0   :  { %s4724_s0 = inlined_call_operand.vmem [shape: f32[1000,16], index: 0, kind: input, shape index: {}]   ;;  %s4725_s1 = inlined_call_operand.vmem [shape: bf16[16,256], index: 1, kind: input, shape index: {}]   ;;  %s4726_s2 = inlined_call_operand.vmem [shape: bf16[128,128], index: 2, kind: input, shape index: {}]   ;;  %s4727_s3 = inlined_call_operand.vmem [shape: bf16[128,128], index: 3, kind: input, shape index: {}]   ;;  %s4728_s4 = inlined_call_operand.vmem [shape: bf16[128,128], index: 4, kind: input, shape index: {}]   ;;  %s4729_s5 = inlined_call_operand.vmem [shape: bf16[128,128], index: 5, kind: input, shape index: {}]   ;;  %s4730_s6 = inlined_call_operand.vmem [shape: bf16[128,128], index: 6, kind: input, shape index: {}]   ;;  %s4731_s7 = inlined_call_operand.vmem [shape: bf16[128,128], index: 7, kind: input, shape index: {}]   ;;  %s4732_s8 = inlined_call_operand.vmem [shape: bf16[128,128], index: 8, kind: input, shape index: {}]   ;;  %s4733_s9 = inlined_call_operand.vmem [shape: bf16[128,8], index: 9, kind: input, shape index: {}]   ;;  %s4734_s10 = inlined_call_operand.vmem [shape: f32[1,128], index: 10, kind: input, shape index: {}]   ;;  %s4735_s11 = inlined_call_operand.vmem [shape: f32[1,128], index: 11, kind: input, shape index: {}]   ;;  %s4736_s12 = inlined_call_operand.vmem [shape: f32[1,128], index: 12, kind: input, shape index: {}]   ;;  %s4737_s13 = inlined_call_operand.vmem [shape: f32[1,128], index: 13, kind: input, shape index: {}]   ;;  %s4738_s14 = inlined_call_operand.vmem [shape: f32[1,128], index: 14, kind: input, shape index: {}]   ;;  %s4739_s15 = inlined_call_operand.vmem [shape: f32[1,128], index: 15, kind: input, shape index: {}]   ;;  %s4740_s16 = inlined_call_operand.vmem [shape: f32[1,128], index: 16, kind: input, shape index: {}]   ;;  %s4741_s17 = inlined_call_operand.vmem [shape: f32[1,128], index: 17, kind: input, shape index: {}]   ;;  %s4742_s18 = inlined_call_operand.vmem [shape: f32[1,8], index: 18, kind: input, shape index: {}]   ;;  %s4743_s19 = inlined_call_operand.vmem [shape: f32[1000,8], index: 19, kind: output, shape index: {}]  }
   0x1   :  { %4750 = sst [smem:[#allocation6_spill]] %s4724_s0 }
   0x2   :  { %4751 = sst [smem:[#allocation7_spill]] %s4725_s1 }
   0x3   :  { %4752 = sst [smem:[#allocation8_spill]] %s4726_s2 }
   0x4   :  { %4753 = sst [smem:[#allocation9_spill]] %s4727_s3 }
   0x5   :  { %4754 = sst [smem:[#allocation10_spill]] %s4728_s4 }
   0x6   :  { %4755 = sst [smem:[#allocation11_spill]] %s4729_s5 }
   0x7   :  { %4756 = sst [smem:[#allocation12_spill]] %s4730_s6 }
   0x8   :  { %4757 = sst [smem:[#allocation13_spill]] %s4743_s19 }
   0x9   :  { %s3677_s0 = smov 0   ;;  %s3679_s30 = smov 0  }
   0xa   :  { %s3681_s20 = smov 0  }
   0xb LB: > { %4758 = sst [smem:[#allocation3_spill]] %s3539_s30  ;;  %s3690_s21 = sadd.s32 4294967295, %s3543_s20   ;;  %s3543_s20 = sphi %s3681_s20, %s4776_s20   ;;  %s3539_s30 = sphi %s3679_s30, %s4778_s30   ;;  %s3535_s0 = sphi %s3677_s0, %s4777_s0  }
   0xc   : > { %s3692_s1 = sadd.s32 1, %s3543_s20   ;;  %s440_s2 = sadd.s32 1, %s3539_s30 }
   0xd   : > { %4759 = sst [smem:[#allocation4_spill]] %s3692_s1  ;;  %s437_s22 = ssub.s32 %s3543_s20, %s3692_s1 }
   0xe   : > { %p438_p0 = scmp.eq.s32.totalorder %s437_s22, 0  ;;  %p450_p1 = scmp.ne.s32.totalorder %s3539_s30, %s3535_s0 }
   0xf   : > { %p451_p2 = scmp.eq.s32.totalorder %s3690_s21, 3  ;;  %p2996_p3 = scmp.ge.s32.totalorder %s3543_s20, 1 }
  0x10   : > { %s3700_s23 = scalar_select %p438_p0, %s3539_s30, %s440_s2  }
  0x11   : > { %p3702_p4 = por %p451_p2, %p450_p1  ;;  %p546_p5 = scmp.lt.s32.totalorder %s3543_s20, 5 }
  0x12   : > { %4760 = sst [smem:[#allocation5_spill]] %s3700_s23 }
  0x13   : > { %p547_p6 = pnand %p2996_p3, %p546_p5 }
  0x14   : > { %s4762_s26 = sld [smem:[#allocation7_spill]] (!%p547_p6)  ;;  %s3713_s29 = sshll.u32 (!%p547_p6), %s3690_s21, 5 }
  0x15   : > { %550 = sbr.rel (%p547_p6) target bundleno = 1626 (0x65a), region = 96  ;;  %p610_p7 = scmp.lt.s32.totalorder (!%p547_p6), %s3713_s29, 124 }
  0x16   : > { %s4763_s20 = sld [smem:[#allocation8_spill]] (!%p547_p6)  ;;  %s602_s1 = sand.u32 (!%p547_p6), 1, %s3535_s0  }
  0x17   : > { %s4765_s19 = sld [smem:[#allocation6_spill]] (!%p547_p6)  ;;  %s2997_s28 = sshll.u32 (!%p547_p6), %s602_s1, 8 }
  0x18   : > { %s4767_s4 = sld [smem:[#allocation10_spill]] (!%p547_p6) }
  0x19   : > { %s4768_s5 = sld [smem:[#allocation11_spill]] (!%p547_p6) }
  0x1a   : > { %v3002_v0 = vld [vmem:[%s4762_s26] sm:$0xf]  ;;  %v3314_v1 = vld [vmem:[%s4762_s26 + $0x4] sm:$0xf0]  ;;  %s611_s30 = scalar_select %p610_p7, %s3713_s29, 124  ;;  %vm685_vm0 = vcmask 130048  }
  0x1b   : > { %v3003_v2 = vor.u32 %v3314_v1, %v3002_v0  ;;  %v3313_v56 = vld [vmem:[%s4762_s26 + $0x4] sm:$0xf]  ;;  %v3004_v57 = vld [vmem:[%s4762_s26 + $0x8] sm:$0xf0]  ;;  %v3850_v63 = vld [vmem:[%s4734_s10] ss:$0 sm:$0xff] }
  0x1c   : > { %s4764_s23 = smov %s4763_s20  ;;  %v3322_v3 = vld [vmem:[%s4763_s20 + $0x38] sm:$0xff]  ;;  %s2999_s25 = sshll.u32 %s611_s30, 3  ;;  %v3007_v60 = vor.u32 %v3313_v56, %v3004_v57  ;;  %vm2620_vm1 = vcmask 64512  }
  0x1d   : > { %741 = vmatpush.bf16.msra.mxu0 %v3003_v2  ;;  %3382 = vmatpush.bf16.msra.mxu2 %v3003_v2  ;;  %s3723_s27 = scalar_lea.vmem %s4765_s19, %s2999_s25  ;;  %v3321_v10 = vld [vmem:[%s4764_s23 + $0x30] sm:$0xff]  ;;  %v3320_v17 = vld [vmem:[%s4764_s23 + $0x28] sm:$0xff]  ;;  %v3319_v24 = vld [vmem:[%s4764_s23 + $0x20] sm:$0xff]  ;;  %s4769_s6 = sld [smem:[#allocation12_spill]] }
  0x1e   : > { %v625_v4 = vld [vmem:[%s3723_s27] sm:$0xff]  ;;  %v626_v5 = vld [vmem:[%s3723_s27 + $0x8] sm:$0xff]  ;;  %v643_v7 = vld [vmem:[%s3723_s27 + $0x90] sm:$0xff]  ;;  %3383 = vmatpush.bf16.msra.mxu3 %v3007_v60  ;;  %830 = vmatpush.bf16.msra.mxu1 %v3007_v60  ;;  %s4471_s20 = scalar_lea.vmem [#allocation2], %s2997_s28   ;;  %s2661_s0 = ssub.s32 (%p3702_p4), 125, %s3713_s29 }
  0x1f   : > { %v3727_v6 = vpack.c.bf16 %v626_v5, %v625_v4  ;;  %v644_v8 = vld [vmem:[%s3723_s27 + $0x98] sm:$0xff]  ;;  %v627_v11 = vld [vmem:[%s3723_s27 + $0x10] sm:$0xff]  ;;  %v645_v13 = vld [vmem:[%s3723_s27 + $0xa0] sm:$0xff]  ;;  %s3379_s25 = sshll.u32 (%p3702_p4), %s3690_s21, 8  ;;  %p2662_p8 = scmp.lt.s32.totalorder (%p3702_p4), %s2661_s0, 32 }
  0x20   : > { %v3731_v9 = vpack.c.bf16 %v644_v8, %v643_v7  ;;  %v628_v12 = vld [vmem:[%s3723_s27 + $0x18] sm:$0xff]  ;;  %v646_v14 = vld [vmem:[%s3723_s27 + $0xa8] sm:$0xff]  ;;  %v629_v18 = vld [vmem:[%s3723_s27 + $0x20] sm:$0xff]  ;;  %s4770_s30 = sld [smem:[#allocation13_spill]] (%p3702_p4) }
  0x21   : > { %1064 = vmatpush.bf16.msrb.mxu2 %v3322_v3  ;;  %3008 = vmatmul.msk.bf16.vlgmr.msra.gmra.mxu0 %vm685_vm0, %v3727_v6  ;;  %v3744_v15 = vpack.c.bf16 %v628_v12, %v627_v11  ;;  %v3746_v16 = vpack.c.bf16 %v646_v14, %v645_v13  ;;  %v630_v19 = vld [vmem:[%s3723_s27 + $0x28] sm:$0xff]  ;;  %v647_v20 = vld [vmem:[%s3723_s27 + $0xb0] sm:$0xff]  ;;  %v648_v21 = vld [vmem:[%s3723_s27 + $0xb8] sm:$0xff] }
  0x22   : > { %3017 = vmatmul.msk.bf16.vlgmr.msra.gmra.mxu2 %vm685_vm0, %v3731_v9  ;;  %v3759_v22 = vpack.c.bf16 %v630_v19, %v629_v18  ;;  %v3761_v23 = vpack.c.bf16 %v648_v21, %v647_v20  ;;  %v631_v25 = vld [vmem:[%s3723_s27 + $0x30] sm:$0xff]  ;;  %v632_v26 = vld [vmem:[%s3723_s27 + $0x38] sm:$0xff]  ;;  %v649_v27 = vld [vmem:[%s3723_s27 + $0xc0] sm:$0xff]  ;;  %3024 = vmatmul.msk.bf16.vlgmr.msra.gmra.mxu1 %vm685_vm0, %v3727_v6 }
  0x23   : > { %v650_v28 = vld [vmem:[%s3723_s27 + $0xc8] sm:$0xff]  ;;  %v3774_v29 = vpack.c.bf16 %v632_v26, %v631_v25  ;;  %v3318_v31 = vld [vmem:[%s4764_s23 + $0x18] sm:$0xff]  ;;  %v633_v32 = vld [vmem:[%s3723_s27 + $0x40] sm:$0xff] }
  0x24   : > { %v3776_v30 = vpack.c.bf16 %v650_v28, %v649_v27  ;;  %v634_v33 = vld [vmem:[%s3723_s27 + $0x48] sm:$0xff]  ;;  %v651_v34 = vld [vmem:[%s3723_s27 + $0xd0] sm:$0xff]  ;;  %v652_v35 = vld [vmem:[%s3723_s27 + $0xd8] sm:$0xff] }
  0x25   : > { %1065 = vmatpush.bf16.msrb.mxu2 %v3321_v10  ;;  %v3789_v36 = vpack.c.bf16 %v634_v33, %v633_v32  ;;  %v3791_v37 = vpack.c.bf16 %v652_v35, %v651_v34  ;;  %v3317_v38 = vld [vmem:[%s4764_s23 + $0x10] sm:$0xff]  ;;  %v636_v40 = vld [vmem:[%s3723_s27 + $0x58] sm:$0xff]  ;;  %v653_v41 = vld [vmem:[%s3723_s27 + $0xe0] sm:$0xff] }
  0x26   : > { %v635_v39 = vld [vmem:[%s3723_s27 + $0x50] sm:$0xff]  ;;  %v654_v42 = vld [vmem:[%s3723_s27 + $0xe8] sm:$0xff]  ;;  %v637_v46 = vld [vmem:[%s3723_s27 + $0x60] sm:$0xff]  ;;  %s4589_s1 = scalar_lea.vmem (%p3702_p4), %s4770_s30, %s3379_s25  }
  0x27   : > { %v3804_v43 = vpack.c.bf16 %v636_v40, %v635_v39  ;;  %v3806_v44 = vpack.c.bf16 %v654_v42, %v653_v41  ;;  %v3316_v45 = vld [vmem:[%s4764_s23 + $0x8] sm:$0xff]  ;;  %v655_v48 = vld [vmem:[%s3723_s27 + $0xf0] sm:$0xff]  ;;  %v656_v49 = vld [vmem:[%s3723_s27 + $0xf8] sm:$0xff] }
  0x28   : > { %v638_v47 = vld [vmem:[%s3723_s27 + $0x68] sm:$0xff]  ;;  %v3821_v51 = vpack.c.bf16 %v656_v49, %v655_v48  ;;  %v3315_v52 = vld [vmem:[%s4764_s23] sm:$0xff]  ;;  %v639_v53 = vld [vmem:[%s3723_s27 + $0x70] sm:$0xff] }
  0x29   : > { %1066 = vmatpush.bf16.msrb.mxu2 %v3320_v17  ;;  %v3819_v50 = vpack.c.bf16 %v638_v47, %v637_v46  ;;  %v640_v54 = vld [vmem:[%s3723_s27 + $0x78] sm:$0xff]  ;;  %v641_v58 = vld [vmem:[%s3723_s27 + $0x80] sm:$0xff]  ;;  %v642_v59 = vld [vmem:[%s3723_s27 + $0x88] sm:$0xff]  ;;  %s4766_s27 = sld [smem:[#allocation9_spill]] }
  0x2a   : > { %v3832_v55 = vpack.c.bf16 %v640_v54, %v639_v53  ;;  %v665_v61 = vpack.c.bf16 %v642_v59, %v641_v58 }
  0x2c   : > { %3032 = vmatmul.msk.bf16.vlgmr.msra.gmra.mxu3 %vm685_vm0, %v665_v61 }
  0x2d   : > { %1067 = vmatpush.bf16.msrb.mxu2 %v3319_v24 }
  0x2f   : > { %v3330_v0 = vld [vmem:[%s4766_s27 + $0x38] sm:$0xff]  ;;  %v3329_v11 = vld [vmem:[%s4766_s27 + $0x30] sm:$0xff]  ;;  %v3328_v20 = vld [vmem:[%s4766_s27 + $0x28] sm:$0xff] }
  0x30   : > { %1269 = vmatpush.bf16.msrb.mxu3 %v3330_v0  ;;  %v3327_v32 = vld [vmem:[%s4766_s27 + $0x20] sm:$0xff]  ;;  %v3326_v41 = vld [vmem:[%s4766_s27 + $0x18] sm:$0xff]  ;;  %v3325_v53 = vld [vmem:[%s4766_s27 + $0x10] sm:$0xff] }
  0x31   : > { %3009 = vmatmul.msk.bf16.gmra.mxu0 %vm685_vm0, %v3744_v15  ;;  %1068 = vmatpush.bf16.msrb.mxu2 %v3318_v31 }
  0x32   : > { %3018 = vmatmul.msk.bf16.gmra.mxu2 %vm685_vm0, %v3746_v16  ;;  %3025 = vmatmul.msk.bf16.gmra.mxu1 %vm685_vm0, %v3744_v15 }
  0x34   : > { %1270 = vmatpush.bf16.msrb.mxu3 %v3329_v11 }
  0x35   : > { %1069 = vmatpush.bf16.msrb.mxu2 %v3317_v38 }
  0x38   : > { %1271 = vmatpush.bf16.msrb.mxu3 %v3328_v20 }
  0x39   : > { %1070 = vmatpush.bf16.msrb.mxu2 %v3316_v45 }
  0x3c   : > { %3033 = vmatmul.msk.bf16.gmra.mxu3 %vm685_vm0, %v3731_v9 }
  0x3d   : > { %1071 = vmatpush.bf16.msrb.mxu2 %v3315_v52  ;;  %1272 = vmatpush.bf16.msrb.mxu3 %v3327_v32 }
  0x41   : > { %3010 = vmatmul.msk.bf16.gmra.mxu0 %vm685_vm0, %v3759_v22  ;;  %1273 = vmatpush.bf16.msrb.mxu3 %v3326_v41 }
  0x42   : > { %3019 = vmatmul.msk.bf16.gmra.mxu2 %vm685_vm0, %v3761_v23  ;;  %3026 = vmatmul.msk.bf16.gmra.mxu1 %vm685_vm0, %v3759_v22 }
  0x45   : > { %1274 = vmatpush.bf16.msrb.mxu3 %v3325_v53 }
  0x4c   : > { %3034 = vmatmul.msk.bf16.gmra.mxu3 %vm685_vm0, %v3746_v16 }
  0x51   : > { %3011 = vmatmul.msk.bf16.gmra.mxu0 %vm685_vm0, %v3774_v29 }
  0x52   : > { %3020 = vmatmul.msk.bf16.gmra.mxu2 %vm685_vm0, %v3776_v30  ;;  %3027 = vmatmul.msk.bf16.gmra.mxu1 %vm685_vm0, %v3774_v29 }
  0x5c   : > { %3035 = vmatmul.msk.bf16.gmra.mxu3 %vm685_vm0, %v3761_v23 }
  0x61   : > { %3012 = vmatmul.msk.bf16.gmra.mxu0 %vm685_vm0, %v3789_v36 }
  0x62   : > { %3021 = vmatmul.msk.bf16.gmra.mxu2 %vm685_vm0, %v3791_v37  ;;  %3028 = vmatmul.msk.bf16.gmra.mxu1 %vm685_vm0, %v3789_v36 }
  0x6c   : > { %3036 = vmatmul.msk.bf16.gmra.mxu3 %vm685_vm0, %v3776_v30 }
  0x71   : > { %3013 = vmatmul.msk.bf16.gmra.mxu0 %vm685_vm0, %v3804_v43 }
  0x72   : > { %3022 = vmatmul.msk.bf16.gmra.mxu2 %vm685_vm0, %v3806_v44  ;;  %3029 = vmatmul.msk.bf16.gmra.mxu1 %vm685_vm0, %v3804_v43 }
  0x7c   : > { %3037 = vmatmul.msk.bf16.gmra.mxu3 %vm685_vm0, %v3791_v37 }
  0x81   : > { %3014 = vmatmul.msk.bf16.gmra.mxu0 %vm685_vm0, %v3819_v50 }
  0x82   : > { %3023 = vmatmul.msk.bf16.gmra.mxu2 %vm685_vm0, %v3821_v51  ;;  %3030 = vmatmul.msk.bf16.gmra.mxu1 %vm685_vm0, %v3819_v50 }
  0x8c   : > { %3038 = vmatmul.msk.bf16.gmra.mxu3 %vm685_vm0, %v3806_v44 }
  0x91   : > { %3015 = vmatmul.msk.bf16.gmra.mxu0 %vm685_vm0, %v3832_v55 }
  0x92   : > { %3031 = vmatmul.msk.bf16.gmra.mxu1 %vm685_vm0, %v3832_v55 }
  0x9c   : > { %3039 = vmatmul.msk.bf16.gmra.mxu3 %vm685_vm0, %v3821_v51 }
  0x9e   : > { %v743_v62 = vpop.f32.mrf.mxu0 }
  0x9f   : > { %v916_v1 = vadd.f32 %v3850_v63, %v743_v62  ;;  %v3324_v62 = vld [vmem:[%s4766_s27 + $0x8] sm:$0xff] }
  0xa0   : > { %1275 = vmatpush.bf16.msrb.mxu3 %v3324_v62 }
  0xa1   : > { %3016 = vmatmul.msk.bf16.gmra.mxu0 %vm685_vm0, %v665_v61  ;;  %v948_v5 = vmax.f32 %v916_v1, 0.0 }
  0xa5   : > { %v3857_v3 = vpop.f32.mrf.mxu2 }
  0xa6   : > { %v745_v2 = vpop.f32.mrf.mxu0 }
  0xa7   : > { %v917_v4 = vadd.f32 %v3850_v63, %v745_v2 }
  0xa9   : > { %v949_v6 = vmax.f32 %v917_v4, 0.0 }
  0xab   : > { %v980_v7 = vpack.c.bf16 %v949_v6, %v948_v5  ;;  %v3323_v6 = vld [vmem:[%s4766_s27] sm:$0xff] }
  0xac   : > { %1276 = vmatpush.bf16.msrb.mxu3 %v3323_v6 }
  0xad   : > { %1072 = vmatmul.bf16.vlgmr.msrb.gmra.mxu2 %v980_v7  ;;  %v3864_v10 = vpop.f32.mrf.mxu2 }
  0xae   : > { %v748_v8 = vpop.f32.mrf.mxu0 }
  0xaf   : > { %v918_v12 = vadd.f32 %v3850_v63, %v748_v8 }
  0xb1   : > { %v950_v14 = vmax.f32 %v918_v12, 0.0 }
  0xb5   : > { %v3875_v17 = vpop.f32.mrf.mxu2 }
  0xb6   : > { %v750_v13 = vpop.f32.mrf.mxu0 }
  0xb7   : > { %v919_v9 = vadd.f32 %v3850_v63, %v750_v13 }
  0xb9   : > { %v951_v15 = vmax.f32 %v919_v9, 0.0 }
  0xbb   : > { %v981_v18 = vpack.c.bf16 %v951_v15, %v950_v14 }
  0xbd   : > { %1077 = vmatmul.bf16.gmra.mxu2 %v981_v18  ;;  %v3880_v21 = vpop.f32.mrf.mxu2  ;;  %v3338_v18 = vld [vmem:[%s4767_s4 + $0x38] sm:$0xff] }
  0xbe   : > { %v753_v19 = vpop.f32.mrf.mxu0  ;;  %1474 = vmatpush.bf16.msrb.mxu0 %v3338_v18  ;;  %v937_v53 = vadd.f32 %v3850_v63, %v3880_v21 }
  0xbf   : > { %v920_v24 = vadd.f32 %v3850_v63, %v753_v19  ;;  %v3950_v19 = vpop.f32.mrf.mxu3 }
  0xc1   : > { %v952_v22 = vmax.f32 %v920_v24, 0.0 }
  0xc5   : > { %v3888_v31 = vpop.f32.mrf.mxu2 }
  0xc6   : > { %v755_v16 = vpop.f32.mrf.mxu0 }
  0xc7   : > { %v921_v25 = vadd.f32 %v3850_v63, %v755_v16 }
  0xc9   : > { %v953_v26 = vmax.f32 %v921_v25, 0.0 }
  0xcb   : > { %v982_v27 = vpack.c.bf16 %v953_v26, %v952_v22 }
  0xcd   : > { %1082 = vmatmul.bf16.gmra.mxu2 %v982_v27  ;;  %v3899_v29 = vpop.f32.mrf.mxu2 }
  0xce   : > { %v758_v28 = vpop.f32.mrf.mxu0 }
  0xcf   : > { %v922_v33 = vadd.f32 %v3850_v63, %v758_v28  ;;  %v3956_v28 = vpop.f32.mrf.mxu3 }
  0xd1   : > { %v954_v35 = vmax.f32 %v922_v33, 0.0  ;;  %v934_v33 = vadd.f32 %v3850_v63, %v3857_v3 }
  0xd5   : > { %v3904_v42 = vpop.f32.mrf.mxu2 }
  0xd6   : > { %v760_v34 = vpop.f32.mrf.mxu0  ;;  %v940_v18 = vadd.f32 %v3850_v63, %v3904_v42 }
  0xd7   : > { %v923_v23 = vadd.f32 %v3850_v63, %v760_v34  ;;  %v935_v34 = vadd.f32 %v3850_v63, %v3864_v10 }
  0xd9   : > { %v955_v38 = vmax.f32 %v923_v23, 0.0  ;;  %v3965_v23 = vld [vmem:[%s4735_s11] ss:$0 sm:$0xff] }
  0xdb   : > { %v983_v39 = vpack.c.bf16 %v955_v38, %v954_v35  ;;  %v3337_v35 = vld [vmem:[%s4767_s4 + $0x30] sm:$0xff]  ;;  %v966_v38 = vmax.f32 %v934_v33, 0.0 }
  0xdc   : > { %1475 = vmatpush.bf16.msrb.mxu0 %v3337_v35 }
  0xdd   : > { %1087 = vmatmul.bf16.gmra.mxu2 %v983_v39  ;;  %v3912_v49 = vpop.f32.mrf.mxu2  ;;  %v967_v39 = vmax.f32 %v935_v34, 0.0 }
  0xde   : > { %v763_v40 = vpop.f32.mrf.mxu0 }
  0xdf   : > { %v924_v45 = vadd.f32 %v3850_v63, %v763_v40 }
  0xe1   : > { %v956_v36 = vmax.f32 %v924_v45, 0.0  ;;  %v3971_v45 = vpop.f32.mrf.mxu3 }
  0xe5   : > { %v3918_v57 = vpop.f32.mrf.mxu2 }
  0xe6   : > { %v765_v30 = vpop.f32.mrf.mxu0 }
  0xe7   : > { %v925_v46 = vadd.f32 %v3850_v63, %v765_v30 }
  0xe9   : > { %v957_v47 = vmax.f32 %v925_v46, 0.0  ;;  %v989_v46 = vpack.c.bf16 %v967_v39, %v966_v38  ;;  %v3334_v38 = vld [vmem:[%s4767_s4 + $0x18] sm:$0xff]  ;;  %v942_v39 = vadd.f32 %v3850_v63, %v3918_v57 }
  0xeb   : > { %v984_v48 = vpack.c.bf16 %v957_v47, %v956_v36 }
  0xed   : > { %1092 = vmatmul.bf16.gmra.mxu2 %v984_v48  ;;  %v3925_v61 = vpop.f32.mrf.mxu2  ;;  %v3974_v48 = vpop.f32.mrf.mxu3 }
  0xee   : > { %v768_v52 = vpop.f32.mrf.mxu0 }
  0xef   : > { %v926_v54 = vadd.f32 %v3850_v63, %v768_v52  ;;  %v936_v52 = vadd.f32 %v3850_v63, %v3875_v17 }
  0xf1   : > { %v958_v43 = vmax.f32 %v926_v54, 0.0  ;;  %v3336_v54 = vld [vmem:[%s4767_s4 + $0x28] sm:$0xff] }
  0xf2   : > { %1476 = vmatpush.bf16.msrb.mxu0 %v3336_v54  ;;  %v3333_v54 = vld [vmem:[%s4767_s4 + $0x10] sm:$0xff] }
  0xf5   : > { %v3936_v4 = vpop.f32.mrf.mxu2 }
  0xf6   : > { %v770_v56 = vpop.f32.mrf.mxu0 }
  0xf7   : > { %v927_v37 = vadd.f32 %v3850_v63, %v770_v56  ;;  %v968_v56 = vmax.f32 %v936_v52, 0.0 }
  0xf9   : > { %v959_v58 = vmax.f32 %v927_v37, 0.0  ;;  %v969_v37 = vmax.f32 %v937_v53, 0.0 }
  0xfb   : > { %v985_v59 = vpack.c.bf16 %v959_v58, %v958_v43 }
  0xfd   : > { %1097 = vmatmul.bf16.gmra.mxu2 %v985_v59  ;;  %v3941_v8 = vpop.f32.mrf.mxu2 }
  0xfe   : > { %v773_v60 = vpop.f32.mrf.mxu0 }
  0xff   : > { %v928_v0 = vadd.f32 %v3850_v63, %v773_v60 }
 0x101   : > { %v960_v50 = vmax.f32 %v928_v0, 0.0  ;;  %v990_v0 = vpack.c.bf16 %v969_v37, %v968_v56  ;;  %v944_v37 = vadd.f32 %v3850_v63, %v3936_v4 }
 0x105   : > { %v3945_v14 = vpop.f32.mrf.mxu2 }
 0x106   : > { %v775_v1 = vpop.f32.mrf.mxu0 }
 0x107   : > { %v929_v44 = vadd.f32 %v3850_v63, %v775_v1  ;;  %v3985_v1 = vpop.f32.mrf.mxu3 }
 0x109   : > { %v961_v2 = vmax.f32 %v929_v44, 0.0  ;;  %v938_v44 = vadd.f32 %v3850_v63, %v3888_v31 }
 0x10b   : > { %v986_v5 = vpack.c.bf16 %v961_v2, %v960_v50  ;;  %v939_v50 = vadd.f32 %v3850_v63, %v3899_v29  ;;  %v3335_v2 = vld [vmem:[%s4767_s4 + $0x20] sm:$0xff]  ;;  %v970_v6 = vmax.f32 %v938_v44, 0.0 }
 0x10c   : > { %1477 = vmatpush.bf16.msrb.mxu0 %v3335_v2  ;;  %v3332_v2 = vld [vmem:[%s4767_s4 + $0x8] sm:$0xff] }
 0x10d   : > { %1102 = vmatmul.bf16.gmra.mxu2 %v986_v5  ;;  %v3954_v25 = vpop.f32.mrf.mxu2 }
 0x10e   : > { %v778_v7 = vpop.f32.mrf.mxu0 }
 0x10f   : > { %v930_v11 = vadd.f32 %v3850_v63, %v778_v7  ;;  %v3994_v5 = vpop.f32.mrf.mxu3  ;;  %v971_v7 = vmax.f32 %v939_v50, 0.0 }
 0x110   : > { %1478 = vmatpush.bf16.msrb.mxu0 %v3334_v38 }
 0x111   : > { %v962_v55 = vmax.f32 %v930_v11, 0.0  ;;  %v991_v31 = vpack.c.bf16 %v971_v7, %v970_v6  ;;  %v946_v7 = vadd.f32 %v3850_v63, %v3945_v14  ;;  %v3331_v14 = vld [vmem:[%s4767_s4] sm:$0xff] }
 0x114   : > { %1479 = vmatpush.bf16.msrb.mxu0 %v3333_v54 }
 0x116   : > { %v780_v51 = vpop.f32.mrf.mxu0 }
 0x117   : > { %v931_v12 = vadd.f32 %v3850_v63, %v780_v51 }
 0x118   : > { %1480 = vmatpush.bf16.msrb.mxu0 %v3332_v2 }
 0x119   : > { %v963_v13 = vmax.f32 %v931_v12, 0.0 }
 0x11b   : > { %v987_v9 = vpack.c.bf16 %v963_v13, %v962_v55 }
 0x11c   : > { %1481 = vmatpush.bf16.msrb.mxu0 %v3331_v14 }
 0x11d   : > { %1107 = vmatmul.bf16.gmra.mxu2 %v987_v9 }
 0x11e   : > { %v783_v15 = vpop.f32.mrf.mxu0 }
 0x11f   : > { %v932_v20 = vadd.f32 %v3850_v63, %v783_v15  ;;  %v3998_v15 = vpop.f32.mrf.mxu3 }
 0x121   : > { %v964_v22 = vmax.f32 %v932_v20, 0.0  ;;  %v941_v20 = vadd.f32 %v3850_v63, %v3912_v49 }
 0x126   : > { %v785_v24 = vpop.f32.mrf.mxu0 }
 0x127   : > { %v933_v16 = vadd.f32 %v3850_v63, %v785_v24  ;;  %v972_v24 = vmax.f32 %v940_v18, 0.0 }
 0x129   : > { %v965_v26 = vmax.f32 %v933_v16, 0.0  ;;  %v973_v16 = vmax.f32 %v941_v20, 0.0 }
 0x12b   : > { %v988_v27 = vpack.c.bf16 %v965_v26, %v964_v22  ;;  %v992_v35 = vpack.c.bf16 %v973_v16, %v972_v24 }
 0x12d   : > { %1112 = vmatmul.bf16.gmra.mxu2 %v988_v27 }
 0x130   : > { %v1073_v32 = vpop.f32.mrf.mxu2 }
 0x131   : > { %v1074_v40 = vadd.f32 %v3965_v23, %v1073_v32  ;;  %v4006_v32 = vpop.f32.mrf.mxu3 }
 0x133   : > { %v1153_v10 = vmax.f32 %v1074_v40, 0.0  ;;  %v943_v40 = vadd.f32 %v3850_v63, %v3925_v61 }
 0x138   : > { %v1075_v41 = vpop.f32.mrf.mxu2 }
 0x139   : > { %v1076_v3 = vadd.f32 %v3965_v23, %v1075_v41  ;;  %v4015_v41 = vpop.f32.mrf.mxu3 }
 0x13b   : > { %v1154_v30 = vmax.f32 %v1076_v3, 0.0  ;;  %v974_v3 = vmax.f32 %v942_v39, 0.0 }
 0x13d   : > { %1117 = vmatmul.bf16.gmra.mxu2 %v989_v46  ;;  %v1185_v36 = vpack.c.bf16 %v1154_v30, %v1153_v10  ;;  %v975_v10 = vmax.f32 %v943_v40, 0.0 }
 0x13f   : > { %1277 = vmatmul.bf16.vlgmr.msrb.gmra.mxu3 %v1185_v36  ;;  %v993_v53 = vpack.c.bf16 %v975_v10, %v974_v3 }
 0x140   : > { %v1078_v47 = vpop.f32.mrf.mxu2 }
 0x141   : > { %v1079_v43 = vadd.f32 %v3965_v23, %v1078_v47  ;;  %v4022_v61 = vpop.f32.mrf.mxu3 }
 0x143   : > { %v1155_v60 = vmax.f32 %v1079_v43, 0.0  ;;  %v945_v43 = vadd.f32 %v3850_v63, %v3941_v8 }
 0x148   : > { %v1080_v58 = vpop.f32.mrf.mxu2 }
 0x149   : > { %v1081_v59 = vadd.f32 %v3965_v23, %v1080_v58  ;;  %v976_v58 = vmax.f32 %v944_v37, 0.0 }
 0x14b   : > { %v1156_v62 = vmax.f32 %v1081_v59, 0.0  ;;  %v977_v59 = vmax.f32 %v945_v43, 0.0 }
 0x14d   : > { %1122 = vmatmul.bf16.gmra.mxu2 %v990_v0  ;;  %v1186_v17 = vpack.c.bf16 %v1156_v62, %v1155_v60  ;;  %v4029_v0 = vpop.f32.mrf.mxu3  ;;  %v994_v50 = vpack.c.bf16 %v977_v59, %v976_v58 }
 0x14f   : > { %1282 = vmatmul.bf16.gmra.mxu3 %v1186_v17 }
 0x150   : > { %v1083_v21 = vpop.f32.mrf.mxu2 }
 0x151   : > { %v1084_v11 = vadd.f32 %v3965_v23, %v1083_v21 }
 0x153   : > { %v1157_v55 = vmax.f32 %v1084_v11, 0.0  ;;  %v947_v11 = vadd.f32 %v3850_v63, %v3954_v25 }
 0x155   : > { %v4035_v6 = vpop.f32.mrf.mxu3 }
 0x158   : > { %v1085_v51 = vpop.f32.mrf.mxu2 }
 0x159   : > { %v1086_v12 = vadd.f32 %v3965_v23, %v1085_v51  ;;  %v978_v51 = vmax.f32 %v946_v7, 0.0 }
 0x15b   : > { %v1158_v13 = vmax.f32 %v1086_v12, 0.0  ;;  %v979_v12 = vmax.f32 %v947_v11, 0.0 }
 0x15d   : > { %1127 = vmatmul.bf16.gmra.mxu2 %v991_v31  ;;  %v1187_v9 = vpack.c.bf16 %v1158_v13, %v1157_v55  ;;  %v995_v18 = vpack.c.bf16 %v979_v12, %v978_v51  ;;  %v4043_v20 = vpop.f32.mrf.mxu3 }
 0x15f   : > { %1287 = vmatmul.bf16.gmra.mxu3 %v1187_v9 }
 0x160   : > { %v1088_v29 = vpop.f32.mrf.mxu2 }
 0x161   : > { %v1089_v22 = vadd.f32 %v3965_v23, %v1088_v29 }
 0x163   : > { %v1159_v33 = vmax.f32 %v1089_v22, 0.0 }
 0x165   : > { %v4048_v25 = vpop.f32.mrf.mxu3 }
 0x168   : > { %v1090_v26 = vpop.f32.mrf.mxu2 }
 0x169   : > { %v1091_v27 = vadd.f32 %v3965_v23, %v1090_v26 }
 0x16b   : > { %v1160_v34 = vmax.f32 %v1091_v27, 0.0 }
 0x16d   : > { %1132 = vmatmul.bf16.gmra.mxu2 %v992_v35  ;;  %v1188_v42 = vpack.c.bf16 %v1160_v34, %v1159_v33  ;;  %v4052_v35 = vpop.f32.mrf.mxu3 }
 0x16f   : > { %1292 = vmatmul.bf16.gmra.mxu3 %v1188_v42 }
 0x170   : > { %v1093_v49 = vpop.f32.mrf.mxu2 }
 0x171   : > { %v1094_v30 = vadd.f32 %v3965_v23, %v1093_v49 }
 0x173   : > { %v1161_v47 = vmax.f32 %v1094_v30, 0.0 }
 0x175   : > { %v4056_v40 = vpop.f32.mrf.mxu3 }
 0x178   : > { %v1095_v46 = vpop.f32.mrf.mxu2 }
 0x179   : > { %v1096_v36 = vadd.f32 %v3965_v23, %v1095_v46  ;;  %v3346_v46 = vld [vmem:[%s4768_s5 + $0x38] sm:$0xff] }
 0x17a   : > { %1679 = vmatpush.bf16.msrb.mxu1 %v3346_v46  ;;  %v3343_v46 = vld [vmem:[%s4768_s5 + $0x20] sm:$0xff] }
 0x17b   : > { %v1162_v52 = vmax.f32 %v1096_v36, 0.0 }
 0x17d   : > { %1137 = vmatmul.bf16.gmra.mxu2 %v993_v53  ;;  %v1189_v57 = vpack.c.bf16 %v1162_v52, %v1161_v47  ;;  %v4064_v52 = vld [vmem:[%s4736_s12] ss:$0 sm:$0xff] }
 0x17f   : > { %1297 = vmatmul.bf16.gmra.mxu3 %v1189_v57 }
 0x180   : > { %v1098_v56 = vpop.f32.mrf.mxu2 }
 0x181   : > { %v1099_v60 = vadd.f32 %v3965_v23, %v1098_v56 }
 0x183   : > { %v1163_v21 = vmax.f32 %v1099_v60, 0.0  ;;  %v3354_v60 = vld [vmem:[%s4769_s6 + $0x38] sm:$0xff] }
 0x184   : > { %1880 = vmatpush.bf16.msra.mxu2 %v3354_v60 }
 0x188   : > { %v1100_v62 = vpop.f32.mrf.mxu2 }
 0x189   : > { %v1101_v17 = vadd.f32 %v3965_v23, %v1100_v62 }
 0x18b   : > { %v1164_v44 = vmax.f32 %v1101_v17, 0.0 }
 0x18d   : > { %1142 = vmatmul.bf16.gmra.mxu2 %v994_v50  ;;  %v1190_v4 = vpack.c.bf16 %v1164_v44, %v1163_v21  ;;  %v3345_v44 = vld [vmem:[%s4768_s5 + $0x30] sm:$0xff] }
 0x18e   : > { %1680 = vmatpush.bf16.msrb.mxu1 %v3345_v44  ;;  %v3342_v44 = vld [vmem:[%s4768_s5 + $0x18] sm:$0xff] }
 0x18f   : > { %1302 = vmatmul.bf16.gmra.mxu3 %v1190_v4 }
 0x190   : > { %v1103_v8 = vpop.f32.mrf.mxu2 }
 0x191   : > { %v1104_v55 = vadd.f32 %v3965_v23, %v1103_v8 }
 0x193   : > { %v1165_v9 = vmax.f32 %v1104_v55, 0.0 }
 0x198   : > { %v1105_v13 = vpop.f32.mrf.mxu2 }
 0x199   : > { %v1106_v31 = vadd.f32 %v3965_v23, %v1105_v13 }
 0x19b   : > { %v1166_v29 = vmax.f32 %v1106_v31, 0.0 }
 0x19d   : > { %1147 = vmatmul.bf16.gmra.mxu2 %v995_v18  ;;  %v1191_v24 = vpack.c.bf16 %v1166_v29, %v1165_v9 }
 0x19f   : > { %1307 = vmatmul.bf16.gmra.mxu3 %v1191_v24  ;;  %v3344_v24 = vld [vmem:[%s4768_s5 + $0x28] sm:$0xff] }
 0x1a0   : > { %v1108_v63 = vpop.f32.mrf.mxu2  ;;  %1681 = vmatpush.bf16.msrb.mxu1 %v3344_v24 }
 0x1a1   : > { %v1109_v16 = vadd.f32 %v3965_v23, %v1108_v63 }
 0x1a3   : > { %v1167_v27 = vmax.f32 %v1109_v16, 0.0 }
 0x1a4   : > { %1682 = vmatpush.bf16.msrb.mxu1 %v3343_v46  ;;  %v3340_v46 = vld [vmem:[%s4768_s5 + $0x8] sm:$0xff] }
 0x1a8   : > { %v1110_v22 = vpop.f32.mrf.mxu2  ;;  %1683 = vmatpush.bf16.msrb.mxu1 %v3342_v44 }
 0x1a9   : > { %v1111_v26 = vadd.f32 %v3965_v23, %v1110_v22 }
 0x1ab   : > { %v1168_v33 = vmax.f32 %v1111_v26, 0.0 }
 0x1ad   : > { %v1192_v34 = vpack.c.bf16 %v1168_v33, %v1167_v27 }
 0x1af   : > { %1312 = vmatmul.bf16.gmra.mxu3 %v1192_v34 }
 0x1b0   : > { %v1113_v38 = vpop.f32.mrf.mxu2 }
 0x1b1   : > { %v1114_v42 = vadd.f32 %v3965_v23, %v1113_v38 }
 0x1b3   : > { %v1169_v3 = vmax.f32 %v1114_v42, 0.0 }
 0x1b8   : > { %v1115_v49 = vpop.f32.mrf.mxu2 }
 0x1b9   : > { %v1116_v39 = vadd.f32 %v3965_v23, %v1115_v49 }
 0x1bb   : > { %v1170_v10 = vmax.f32 %v1116_v39, 0.0  ;;  %v3353_v39 = vld [vmem:[%s4769_s6 + $0x30] sm:$0xff] }
 0x1bc   : > { %1881 = vmatpush.bf16.msra.mxu2 %v3353_v39 }
 0x1bd   : > { %v1193_v30 = vpack.c.bf16 %v1170_v10, %v1169_v3 }
 0x1bf   : > { %1317 = vmatmul.bf16.gmra.mxu3 %v1193_v30 }
 0x1c0   : > { %v1118_v36 = vpop.f32.mrf.mxu2 }
 0x1c1   : > { %v1119_v53 = vadd.f32 %v3965_v23, %v1118_v36 }
 0x1c2   : > { %v1278_v47 = vpop.f32.mrf.mxu3 }
 0x1c3   : > { %v1279_v57 = vadd.f32 %v4064_v52, %v1278_v47  ;;  %v1171_v43 = vmax.f32 %v1119_v53, 0.0 }
 0x1c5   : > { %v1358_v62 = vmax.f32 %v1279_v57, 0.0 }
 0x1c8   : > { %v1120_v54 = vpop.f32.mrf.mxu2 }
 0x1c9   : > { %v1121_v56 = vadd.f32 %v3965_v23, %v1120_v54 }
 0x1ca   : > { %v1280_v37 = vpop.f32.mrf.mxu3 }
 0x1cb   : > { %v1172_v58 = vmax.f32 %v1121_v56, 0.0  ;;  %v1281_v59 = vadd.f32 %v4064_v52, %v1280_v37 }
 0x1cd   : > { %v1359_v17 = vmax.f32 %v1281_v59, 0.0  ;;  %v1194_v21 = vpack.c.bf16 %v1172_v58, %v1171_v43 }
 0x1cf   : > { %1322 = vmatmul.bf16.gmra.mxu3 %v1194_v21  ;;  %v1390_v50 = vpack.c.bf16 %v1359_v17, %v1358_v62 }
 0x1d0   : > { %v1123_v2 = vpop.f32.mrf.mxu2 }
 0x1d1   : > { %1482 = vmatmul.bf16.vlgmr.msrb.gmra.mxu0 %v1390_v50  ;;  %v1124_v8 = vadd.f32 %v3965_v23, %v1123_v2 }
 0x1d2   : > { %v1283_v4 = vpop.f32.mrf.mxu3 }
 0x1d3   : > { %v1284_v11 = vadd.f32 %v4064_v52, %v1283_v4  ;;  %v1173_v55 = vmax.f32 %v1124_v8, 0.0 }
 0x1d5   : > { %v1360_v9 = vmax.f32 %v1284_v11, 0.0 }
 0x1d8   : > { %v1125_v7 = vpop.f32.mrf.mxu2 }
 0x1d9   : > { %v1126_v51 = vadd.f32 %v3965_v23, %v1125_v7 }
 0x1da   : > { %v1285_v12 = vpop.f32.mrf.mxu3 }
 0x1db   : > { %v1174_v13 = vmax.f32 %v1126_v51, 0.0  ;;  %v1286_v31 = vadd.f32 %v4064_v52, %v1285_v12 }
 0x1dd   : > { %v1361_v29 = vmax.f32 %v1286_v31, 0.0  ;;  %v1195_v18 = vpack.c.bf16 %v1174_v13, %v1173_v55 }
 0x1df   : > { %1327 = vmatmul.bf16.gmra.mxu3 %v1195_v18  ;;  %v1391_v14 = vpack.c.bf16 %v1361_v29, %v1360_v9  ;;  %v3352_v9 = vld [vmem:[%s4769_s6 + $0x28] sm:$0xff] }
 0x1e0   : > { %v1128_v63 = vpop.f32.mrf.mxu2  ;;  %1882 = vmatpush.bf16.msra.mxu2 %v3352_v9 }
 0x1e1   : > { %1487 = vmatmul.bf16.gmra.mxu0 %v1391_v14  ;;  %v1129_v22 = vadd.f32 %v3965_v23, %v1128_v63  ;;  %v3341_v14 = vld [vmem:[%s4768_s5 + $0x10] sm:$0xff] }
 0x1e2   : > { %v1288_v16 = vpop.f32.mrf.mxu3  ;;  %1684 = vmatpush.bf16.msrb.mxu1 %v3341_v14 }
 0x1e3   : > { %v1289_v27 = vadd.f32 %v4064_v52, %v1288_v16  ;;  %v1175_v38 = vmax.f32 %v1129_v22, 0.0 }
 0x1e5   : > { %v1362_v3 = vmax.f32 %v1289_v27, 0.0 }
 0x1e6   : > { %1685 = vmatpush.bf16.msrb.mxu1 %v3340_v46 }
 0x1e8   : > { %v1130_v26 = vpop.f32.mrf.mxu2 }
 0x1e9   : > { %v1131_v33 = vadd.f32 %v3965_v23, %v1130_v26 }
 0x1ea   : > { %v1290_v34 = vpop.f32.mrf.mxu3 }
 0x1eb   : > { %v1176_v42 = vmax.f32 %v1131_v33, 0.0  ;;  %v1291_v49 = vadd.f32 %v4064_v52, %v1290_v34 }
 0x1ed   : > { %v1363_v10 = vmax.f32 %v1291_v49, 0.0  ;;  %v1196_v30 = vpack.c.bf16 %v1176_v42, %v1175_v38 }
 0x1ef   : > { %1332 = vmatmul.bf16.gmra.mxu3 %v1196_v30  ;;  %v1392_v36 = vpack.c.bf16 %v1363_v10, %v1362_v3 }
 0x1f0   : > { %v1133_v47 = vpop.f32.mrf.mxu2 }
 0x1f1   : > { %1492 = vmatmul.bf16.gmra.mxu0 %v1392_v36  ;;  %v1134_v54 = vadd.f32 %v3965_v23, %v1133_v47 }
 0x1f2   : > { %v1293_v53 = vpop.f32.mrf.mxu3 }
 0x1f3   : > { %v1294_v56 = vadd.f32 %v4064_v52, %v1293_v53  ;;  %v1177_v58 = vmax.f32 %v1134_v54, 0.0  ;;  %v3351_v54 = vld [vmem:[%s4769_s6 + $0x20] sm:$0xff] }
 0x1f4   : > { %1883 = vmatpush.bf16.msra.mxu2 %v3351_v54  ;;  %v3362_v54 = vld [vmem:[%s4731_s7 + $0x38] sm:$0xff] }
 0x1f5   : > { %v1364_v62 = vmax.f32 %v1294_v56, 0.0  ;;  %2121 = vmatpush.bf16.msra.mxu3 %v3362_v54 }
 0x1f8   : > { %v1135_v57 = vpop.f32.mrf.mxu2 }
 0x1f9   : > { %v1136_v37 = vadd.f32 %v3965_v23, %v1135_v57 }
 0x1fa   : > { %v1295_v43 = vpop.f32.mrf.mxu3 }
 0x1fb   : > { %v1178_v59 = vmax.f32 %v1136_v37, 0.0  ;;  %v1296_v60 = vadd.f32 %v4064_v52, %v1295_v43 }
 0x1fd   : > { %v1365_v17 = vmax.f32 %v1296_v60, 0.0  ;;  %v1197_v21 = vpack.c.bf16 %v1178_v59, %v1177_v58 }
 0x1ff   : > { %1337 = vmatmul.bf16.gmra.mxu3 %v1197_v21  ;;  %v1393_v50 = vpack.c.bf16 %v1365_v17, %v1364_v62 }
 0x200   : > { %v1138_v2 = vpop.f32.mrf.mxu2 }
 0x201   : > { %1497 = vmatmul.bf16.gmra.mxu0 %v1393_v50  ;;  %v1139_v8 = vadd.f32 %v3965_v23, %v1138_v2  ;;  %v3339_v50 = vld [vmem:[%s4768_s5] sm:$0xff] }
 0x202   : > { %v1298_v4 = vpop.f32.mrf.mxu3  ;;  %1686 = vmatpush.bf16.msrb.mxu1 %v3339_v50 }
 0x203   : > { %v1299_v11 = vadd.f32 %v4064_v52, %v1298_v4  ;;  %v1179_v55 = vmax.f32 %v1139_v8, 0.0 }
 0x205   : > { %v1366_v29 = vmax.f32 %v1299_v11, 0.0  ;;  %v4129_v11 = vpop.f32.mrf.mxu1 }
 0x208   : > { %v1140_v7 = vpop.f32.mrf.mxu2 }
 0x209   : > { %v1141_v51 = vadd.f32 %v3965_v23, %v1140_v7 }
 0x20a   : > { %v1300_v12 = vpop.f32.mrf.mxu3 }
 0x20b   : > { %v1180_v13 = vmax.f32 %v1141_v51, 0.0  ;;  %v1301_v31 = vadd.f32 %v4064_v52, %v1300_v12 }
 0x20d   : > { %v1367_v18 = vmax.f32 %v1301_v31, 0.0  ;;  %v1198_v24 = vpack.c.bf16 %v1180_v13, %v1179_v55  ;;  %v4131_v31 = vpop.f32.mrf.mxu1 }
 0x20f   : > { %1342 = vmatmul.bf16.gmra.mxu3 %v1198_v24  ;;  %v1394_v63 = vpack.c.bf16 %v1367_v18, %v1366_v29  ;;  %v3350_v29 = vld [vmem:[%s4769_s6 + $0x18] sm:$0xff] }
 0x210   : > { %v1143_v16 = vpop.f32.mrf.mxu2  ;;  %1884 = vmatpush.bf16.msra.mxu2 %v3350_v29 }
 0x211   : > { %1502 = vmatmul.bf16.gmra.mxu0 %v1394_v63  ;;  %v1144_v26 = vadd.f32 %v3965_v23, %v1143_v16 }
 0x212   : > { %v1303_v22 = vpop.f32.mrf.mxu3 }
 0x213   : > { %v1304_v33 = vadd.f32 %v4064_v52, %v1303_v22  ;;  %v1181_v42 = vmax.f32 %v1144_v26, 0.0 }
 0x215   : > { %v1368_v3 = vmax.f32 %v1304_v33, 0.0  ;;  %v4138_v26 = vpop.f32.mrf.mxu1 }
 0x218   : > { %v1145_v27 = vpop.f32.mrf.mxu2 }
 0x219   : > { %v1146_v34 = vadd.f32 %v3965_v23, %v1145_v27  ;;  %v4143_v27 = vld [vmem:[%s4737_s13] ss:$0 sm:$0xff] }
 0x21a   : > { %v1305_v38 = vpop.f32.mrf.mxu3 }
 0x21b   : > { %v1182_v49 = vmax.f32 %v1146_v34, 0.0  ;;  %v1306_v39 = vadd.f32 %v4064_v52, %v1305_v38 }
 0x21d   : > { %v1369_v10 = vmax.f32 %v1306_v39, 0.0  ;;  %v1199_v30 = vpack.c.bf16 %v1182_v49, %v1181_v42 }
 0x21f   : > { %1347 = vmatmul.bf16.gmra.mxu3 %v1199_v30  ;;  %v1395_v36 = vpack.c.bf16 %v1369_v10, %v1368_v3  ;;  %v4148_v30 = vpop.f32.mrf.mxu1 }
 0x220   : > { %v1148_v47 = vpop.f32.mrf.mxu2 }
 0x221   : > { %1507 = vmatmul.bf16.gmra.mxu0 %v1395_v36  ;;  %v1149_v57 = vadd.f32 %v3965_v23, %v1148_v47 }
 0x222   : > { %v1308_v53 = vpop.f32.mrf.mxu3 }
 0x223   : > { %v1309_v37 = vadd.f32 %v4064_v52, %v1308_v53  ;;  %v1183_v59 = vmax.f32 %v1149_v57, 0.0 }
 0x225   : > { %v1370_v17 = vmax.f32 %v1309_v37, 0.0 }
 0x228   : > { %v1150_v56 = vpop.f32.mrf.mxu2 }
 0x229   : > { %v1151_v43 = vadd.f32 %v3965_v23, %v1150_v56 }
 0x22a   : > { %v1310_v58 = vpop.f32.mrf.mxu3 }
 0x22b   : > { %v1184_v60 = vmax.f32 %v1151_v43, 0.0  ;;  %v1311_v62 = vadd.f32 %v4064_v52, %v1310_v58  ;;  %v4154_v43 = vpop.f32.mrf.mxu1 }
 0x22d   : > { %v1371_v21 = vmax.f32 %v1311_v62, 0.0  ;;  %v1200_v44 = vpack.c.bf16 %v1184_v60, %v1183_v59 }
 0x22f   : > { %1352 = vmatmul.bf16.gmra.mxu3 %v1200_v44  ;;  %v1396_v2 = vpack.c.bf16 %v1371_v21, %v1370_v17  ;;  %v3349_v44 = vld [vmem:[%s4769_s6 + $0x10] sm:$0xff] }
 0x230   : > { %1885 = vmatpush.bf16.msra.mxu2 %v3349_v44 }
 0x231   : > { %1512 = vmatmul.bf16.gmra.mxu0 %v1396_v2 }
 0x232   : > { %v1313_v4 = vpop.f32.mrf.mxu3 }
 0x233   : > { %v1314_v8 = vadd.f32 %v4064_v52, %v1313_v4 }
 0x235   : > { %v1372_v51 = vmax.f32 %v1314_v8, 0.0 }
 0x23a   : > { %v1315_v23 = vpop.f32.mrf.mxu3 }
 0x23b   : > { %v1316_v7 = vadd.f32 %v4064_v52, %v1315_v23 }
 0x23d   : > { %v1373_v12 = vmax.f32 %v1316_v7, 0.0 }
 0x23f   : > { %v1397_v55 = vpack.c.bf16 %v1373_v12, %v1372_v51  ;;  %v4163_v51 = vpop.f32.mrf.mxu1 }
 0x241   : > { %1517 = vmatmul.bf16.gmra.mxu0 %v1397_v55 }
 0x242   : > { %v1318_v13 = vpop.f32.mrf.mxu3 }
 0x243   : > { %v1319_v9 = vadd.f32 %v4064_v52, %v1318_v13 }
 0x245   : > { %v1374_v14 = vmax.f32 %v1319_v9, 0.0 }
 0x24a   : > { %v1320_v18 = vpop.f32.mrf.mxu3 }
 0x24b   : > { %v1321_v24 = vadd.f32 %v4064_v52, %v1320_v18  ;;  %v4167_v18 = vpop.f32.mrf.mxu1 }
 0x24d   : > { %v1375_v63 = vmax.f32 %v1321_v24, 0.0 }
 0x24e   : > { %v1483_v16 = vpop.f32.mrf.mxu0 }
 0x24f   : > { %v1398_v22 = vpack.c.bf16 %v1375_v63, %v1374_v14  ;;  %v1484_v34 = vadd.f32 %v4143_v27, %v1483_v16 }
 0x251   : > { %1522 = vmatmul.bf16.gmra.mxu0 %v1398_v22  ;;  %v1563_v49 = vmax.f32 %v1484_v34, 0.0 }
 0x252   : > { %v1323_v33 = vpop.f32.mrf.mxu3 }
 0x253   : > { %v1324_v39 = vadd.f32 %v4064_v52, %v1323_v33 }
 0x255   : > { %v1376_v47 = vmax.f32 %v1324_v39, 0.0 }
 0x256   : > { %v1485_v38 = vpop.f32.mrf.mxu0 }
 0x257   : > { %v1486_v42 = vadd.f32 %v4143_v27, %v1485_v38 }
 0x259   : > { %v1564_v3 = vmax.f32 %v1486_v42, 0.0  ;;  %v3361_v42 = vld [vmem:[%s4731_s7 + $0x30] sm:$0xff] }
 0x25a   : > { %v1325_v10 = vpop.f32.mrf.mxu3  ;;  %2122 = vmatpush.bf16.msra.mxu3 %v3361_v42 }
 0x25b   : > { %v1326_v46 = vadd.f32 %v4064_v52, %v1325_v10  ;;  %v1595_v36 = vpack.c.bf16 %v1564_v3, %v1563_v49  ;;  %v4174_v10 = vpop.f32.mrf.mxu1 }
 0x25d   : > { %v1377_v53 = vmax.f32 %v1326_v46, 0.0  ;;  %1687 = vmatmul.bf16.vlgmr.msrb.gmra.mxu1 %v1595_v36 }
 0x25e   : > { %v1488_v57 = vpop.f32.mrf.mxu0 }
 0x25f   : > { %v1399_v56 = vpack.c.bf16 %v1377_v53, %v1376_v47  ;;  %v1489_v58 = vadd.f32 %v4143_v27, %v1488_v57 }
 0x261   : > { %1527 = vmatmul.bf16.gmra.mxu0 %v1399_v56  ;;  %v1565_v62 = vmax.f32 %v1489_v58, 0.0  ;;  %v3348_v56 = vld [vmem:[%s4769_s6 + $0x8] sm:$0xff] }
 0x262   : > { %v1328_v37 = vpop.f32.mrf.mxu3  ;;  %1886 = vmatpush.bf16.msra.mxu2 %v3348_v56 }
 0x263   : > { %v1329_v17 = vadd.f32 %v4064_v52, %v1328_v37 }
 0x265   : > { %v1378_v8 = vmax.f32 %v1329_v17, 0.0 }
 0x266   : > { %v1490_v59 = vpop.f32.mrf.mxu0 }
 0x267   : > { %v1491_v60 = vadd.f32 %v4143_v27, %v1490_v59 }
 0x269   : > { %v1566_v21 = vmax.f32 %v1491_v60, 0.0  ;;  %v4183_v60 = vpop.f32.mrf.mxu1 }
 0x26a   : > { %v1330_v50 = vpop.f32.mrf.mxu3 }
 0x26b   : > { %v1331_v2 = vadd.f32 %v4064_v52, %v1330_v50  ;;  %v1596_v4 = vpack.c.bf16 %v1566_v21, %v1565_v62 }
 0x26d   : > { %v1379_v23 = vmax.f32 %v1331_v2, 0.0  ;;  %1692 = vmatmul.bf16.gmra.mxu1 %v1596_v4 }
 0x26e   : > { %v1493_v7 = vpop.f32.mrf.mxu0 }
 0x26f   : > { %v1400_v12 = vpack.c.bf16 %v1379_v23, %v1378_v8  ;;  %v1494_v13 = vadd.f32 %v4143_v27, %v1493_v7 }
 0x271   : > { %1532 = vmatmul.bf16.gmra.mxu0 %v1400_v12  ;;  %v1567_v24 = vmax.f32 %v1494_v13, 0.0  ;;  %v4186_v8 = vpop.f32.mrf.mxu1 }
 0x272   : > { %v1333_v55 = vpop.f32.mrf.mxu3 }
 0x273   : > { %v1334_v14 = vadd.f32 %v4064_v52, %v1333_v55 }
 0x275   : > { %v1380_v34 = vmax.f32 %v1334_v14, 0.0 }
 0x276   : > { %v1495_v9 = vpop.f32.mrf.mxu0 }
 0x277   : > { %v1496_v29 = vadd.f32 %v4143_v27, %v1495_v9 }
 0x279   : > { %v1568_v63 = vmax.f32 %v1496_v29, 0.0 }
 0x27a   : > { %v1335_v16 = vpop.f32.mrf.mxu3 }
 0x27b   : > { %v1336_v22 = vadd.f32 %v4064_v52, %v1335_v16  ;;  %v1597_v33 = vpack.c.bf16 %v1568_v63, %v1567_v24  ;;  %v3360_v63 = vld [vmem:[%s4731_s7 + $0x28] sm:$0xff] }
 0x27c   : > { %2123 = vmatpush.bf16.msra.mxu3 %v3360_v63 }
 0x27d   : > { %v1381_v38 = vmax.f32 %v1336_v22, 0.0  ;;  %1697 = vmatmul.bf16.gmra.mxu1 %v1597_v33  ;;  %v4194_v33 = vpop.f32.mrf.mxu1 }
 0x27e   : > { %v1498_v49 = vpop.f32.mrf.mxu0 }
 0x27f   : > { %v1401_v39 = vpack.c.bf16 %v1381_v38, %v1380_v34  ;;  %v1499_v46 = vadd.f32 %v4143_v27, %v1498_v49 }
 0x281   : > { %1537 = vmatmul.bf16.gmra.mxu0 %v1401_v39  ;;  %v1569_v53 = vmax.f32 %v1499_v46, 0.0 }
 0x282   : > { %v1338_v3 = vpop.f32.mrf.mxu3 }
 0x283   : > { %v1339_v54 = vadd.f32 %v4064_v52, %v1338_v3 }
 0x285   : > { %v1382_v62 = vmax.f32 %v1339_v54, 0.0 }
 0x286   : > { %v1500_v36 = vpop.f32.mrf.mxu0 }
 0x287   : > { %v1501_v47 = vadd.f32 %v4143_v27, %v1500_v36  ;;  %v3347_v36 = vld [vmem:[%s4769_s6] sm:$0xff] }
 0x288   : > { %1887 = vmatpush.bf16.msra.mxu2 %v3347_v36 }
 0x289   : > { %v1570_v57 = vmax.f32 %v1501_v47, 0.0  ;;  %v4202_v47 = vpop.f32.mrf.mxu1 }
 0x28a   : > { %v1340_v37 = vpop.f32.mrf.mxu3 }
 0x28b   : > { %v1341_v58 = vadd.f32 %v4064_v52, %v1340_v37  ;;  %v1598_v59 = vpack.c.bf16 %v1570_v57, %v1569_v53 }
 0x28d   : > { %v1383_v17 = vmax.f32 %v1341_v58, 0.0  ;;  %1702 = vmatmul.bf16.gmra.mxu1 %v1598_v59 }
 0x28e   : > { %v1503_v21 = vpop.f32.mrf.mxu0 }
 0x28f   : > { %v1402_v44 = vpack.c.bf16 %v1383_v17, %v1382_v62  ;;  %v1504_v2 = vadd.f32 %v4143_v27, %v1503_v21 }
 0x291   : > { %1542 = vmatmul.bf16.gmra.mxu0 %v1402_v44  ;;  %v1571_v7 = vmax.f32 %v1504_v2, 0.0  ;;  %v4205_v17 = vpop.f32.mrf.mxu1 }
 0x292   : > { %v1343_v50 = vpop.f32.mrf.mxu3 }
 0x293   : > { %v1344_v12 = vadd.f32 %v4064_v52, %v1343_v50 }
 0x295   : > { %v1384_v24 = vmax.f32 %v1344_v12, 0.0 }
 0x296   : > { %v1505_v4 = vpop.f32.mrf.mxu0 }
 0x297   : > { %v1506_v23 = vadd.f32 %v4143_v27, %v1505_v4 }
 0x299   : > { %v1572_v55 = vmax.f32 %v1506_v23, 0.0 }
 0x29a   : > { %v1345_v13 = vpop.f32.mrf.mxu3 }
 0x29b   : > { %v1346_v9 = vadd.f32 %v4064_v52, %v1345_v13  ;;  %v1599_v29 = vpack.c.bf16 %v1572_v55, %v1571_v7 }
 0x29d   : > { %v1385_v14 = vmax.f32 %v1346_v9, 0.0  ;;  %1707 = vmatmul.bf16.gmra.mxu1 %v1599_v29  ;;  %v3359_v29 = vld [vmem:[%s4731_s7 + $0x20] sm:$0xff] }
 0x29e   : > { %v1508_v16 = vpop.f32.mrf.mxu0  ;;  %2124 = vmatpush.bf16.msra.mxu3 %v3359_v29 }
 0x29f   : > { %v1403_v22 = vpack.c.bf16 %v1385_v14, %v1384_v24  ;;  %v1509_v38 = vadd.f32 %v4143_v27, %v1508_v16  ;;  %v4214_v24 = vpop.f32.mrf.mxu1 }
 0x2a1   : > { %1547 = vmatmul.bf16.gmra.mxu0 %v1403_v22  ;;  %v1573_v39 = vmax.f32 %v1509_v38, 0.0 }
 0x2a2   : > { %v1348_v34 = vpop.f32.mrf.mxu3 }
 0x2a3   : > { %v1349_v3 = vadd.f32 %v4064_v52, %v1348_v34 }
 0x2a5   : > { %v1386_v56 = vmax.f32 %v1349_v3, 0.0 }
 0x2a6   : > { %v1510_v42 = vpop.f32.mrf.mxu0 }
 0x2a7   : > { %v1511_v49 = vadd.f32 %v4143_v27, %v1510_v42 }
 0x2a9   : > { %v1574_v46 = vmax.f32 %v1511_v49, 0.0 }
 0x2aa   : > { %v1350_v53 = vpop.f32.mrf.mxu3 }
 0x2ab   : > { %v1351_v54 = vadd.f32 %v4064_v52, %v1350_v53  ;;  %v1600_v57 = vpack.c.bf16 %v1574_v46, %v1573_v39 }
 0x2ad   : > { %v1387_v37 = vmax.f32 %v1351_v54, 0.0  ;;  %1712 = vmatmul.bf16.gmra.mxu1 %v1600_v57 }
 0x2ae   : > { %v1513_v58 = vpop.f32.mrf.mxu0 }
 0x2af   : > { %v1404_v59 = vpack.c.bf16 %v1387_v37, %v1386_v56  ;;  %v1514_v21 = vadd.f32 %v4143_v27, %v1513_v58  ;;  %v4227_v58 = vld [vmem:[%s4738_s14] ss:$0 sm:$0xff] }
 0x2b1   : > { %1552 = vmatmul.bf16.gmra.mxu0 %v1404_v59  ;;  %v1575_v2 = vmax.f32 %v1514_v21, 0.0  ;;  %v3358_v59 = vld [vmem:[%s4731_s7 + $0x18] sm:$0xff] }
 0x2b2   : > { %v1353_v62 = vpop.f32.mrf.mxu3  ;;  %2125 = vmatpush.bf16.msra.mxu3 %v3358_v59  ;;  %v3357_v59 = vld [vmem:[%s4731_s7 + $0x10] sm:$0xff] }
 0x2b3   : > { %v1354_v4 = vadd.f32 %v4064_v52, %v1353_v62 }
 0x2b5   : > { %v1388_v13 = vmax.f32 %v1354_v4, 0.0 }
 0x2b6   : > { %v1515_v44 = vpop.f32.mrf.mxu0  ;;  %2126 = vmatpush.bf16.msra.mxu3 %v3357_v59  ;;  %v3356_v59 = vld [vmem:[%s4731_s7 + $0x8] sm:$0xff] }
 0x2b7   : > { %v1516_v50 = vadd.f32 %v4143_v27, %v1515_v44 }
 0x2b9   : > { %v1576_v23 = vmax.f32 %v1516_v50, 0.0 }
 0x2ba   : > { %v1355_v7 = vpop.f32.mrf.mxu3  ;;  %2127 = vmatpush.bf16.msra.mxu3 %v3356_v59  ;;  %v3355_v59 = vld [vmem:[%s4731_s7] sm:$0xff] }
 0x2bb   : > { %v1356_v12 = vadd.f32 %v4064_v52, %v1355_v7  ;;  %v1601_v55 = vpack.c.bf16 %v1576_v23, %v1575_v2  ;;  %v4218_v52 = vpop.f32.mrf.mxu1 }
 0x2bd   : > { %v1389_v9 = vmax.f32 %v1356_v12, 0.0  ;;  %1717 = vmatmul.bf16.gmra.mxu1 %v1601_v55 }
 0x2be   : > { %v1518_v14 = vpop.f32.mrf.mxu0  ;;  %2128 = vmatpush.bf16.msra.mxu3 %v3355_v59 }
 0x2bf   : > { %v1405_v63 = vpack.c.bf16 %v1389_v9, %v1388_v13  ;;  %v1519_v16 = vadd.f32 %v4143_v27, %v1518_v14 }
 0x2c1   : > { %1557 = vmatmul.bf16.gmra.mxu0 %v1405_v63  ;;  %v1577_v38 = vmax.f32 %v1519_v16, 0.0 }
 0x2c3   : > { %v4220_v3 = vpop.f32.mrf.mxu1 }
 0x2c6   : > { %v1520_v22 = vpop.f32.mrf.mxu0 }
 0x2c7   : > { %v1521_v34 = vadd.f32 %v4143_v27, %v1520_v22 }
 0x2c9   : > { %v1578_v42 = vmax.f32 %v1521_v34, 0.0 }
 0x2cb   : > { %v1602_v49 = vpack.c.bf16 %v1578_v42, %v1577_v38 }
 0x2cd   : > { %1722 = vmatmul.bf16.gmra.mxu1 %v1602_v49 }
 0x2ce   : > { %v1523_v39 = vpop.f32.mrf.mxu0 }
 0x2cf   : > { %v1524_v46 = vadd.f32 %v4143_v27, %v1523_v39  ;;  %v3370_v39 = vld [vmem:[%s4732_s8 + $0x38] sm:$0xff] }
 0x2d0   : > { %2326 = vmatpush.bf16.msra.mxu0 %v3370_v39  ;;  %3384 = vmatpush.bf16.msrb.mxu2 %v3370_v39  ;;  %v3369_v39 = vld [vmem:[%s4732_s8 + $0x30] sm:$0xff] }
 0x2d1   : > { %v1579_v54 = vmax.f32 %v1524_v46, 0.0 }
 0x2d4   : > { %2327 = vmatpush.bf16.msra.mxu0 %v3369_v39  ;;  %3385 = vmatpush.bf16.msrb.mxu2 %v3369_v39  ;;  %v3368_v39 = vld [vmem:[%s4732_s8 + $0x28] sm:$0xff] }
 0x2d6   : > { %v1525_v36 = vpop.f32.mrf.mxu0 }
 0x2d7   : > { %v1526_v53 = vadd.f32 %v4143_v27, %v1525_v36 }
 0x2d8   : > { %2328 = vmatpush.bf16.msra.mxu0 %v3368_v39  ;;  %3386 = vmatpush.bf16.msrb.mxu2 %v3368_v39 }
 0x2d9   : > { %v1580_v57 = vmax.f32 %v1526_v53, 0.0 }
 0x2da   : > { %v1688_v56 = vpop.f32.mrf.mxu1 }
 0x2db   : > { %v1603_v37 = vpack.c.bf16 %v1580_v57, %v1579_v54  ;;  %v1689_v21 = vadd.f32 %v4227_v58, %v1688_v56 }
 0x2dd   : > { %1727 = vmatmul.bf16.gmra.mxu1 %v1603_v37  ;;  %v1768_v2 = vmax.f32 %v1689_v21, 0.0 }
 0x2de   : > { %v1528_v62 = vpop.f32.mrf.mxu0 }
 0x2df   : > { %v1529_v4 = vadd.f32 %v4143_v27, %v1528_v62 }
 0x2e1   : > { %v1581_v13 = vmax.f32 %v1529_v4, 0.0 }
 0x2e2   : > { %v1690_v44 = vpop.f32.mrf.mxu1 }
 0x2e3   : > { %v1691_v50 = vadd.f32 %v4227_v58, %v1690_v44 }
 0x2e5   : > { %v1769_v23 = vmax.f32 %v1691_v50, 0.0 }
 0x2e6   : > { %v1530_v7 = vpop.f32.mrf.mxu0 }
 0x2e7   : > { %v1800_v12 = vpack.c.bf16 %v1769_v23, %v1768_v2  ;;  %v1531_v55 = vadd.f32 %v4143_v27, %v1530_v7 }
 0x2e9   : > { %v1582_v9 = vmax.f32 %v1531_v55, 0.0  ;;  %1888 = vmatmul.bf16.vlgmr.msra.gmra.mxu2 %v1800_v12 }
 0x2ea   : > { %v1693_v29 = vpop.f32.mrf.mxu1 }
 0x2eb   : > { %v1604_v14 = vpack.c.bf16 %v1582_v9, %v1581_v13  ;;  %v1694_v16 = vadd.f32 %v4227_v58, %v1693_v29 }
 0x2ed   : > { %1732 = vmatmul.bf16.gmra.mxu1 %v1604_v14  ;;  %v1770_v38 = vmax.f32 %v1694_v16, 0.0 }
 0x2ee   : > { %v1533_v63 = vpop.f32.mrf.mxu0 }
 0x2ef   : > { %v1534_v42 = vadd.f32 %v4143_v27, %v1533_v63 }
 0x2f1   : > { %v1583_v54 = vmax.f32 %v1534_v42, 0.0 }
 0x2f2   : > { %v1695_v22 = vpop.f32.mrf.mxu1 }
 0x2f3   : > { %v1696_v34 = vadd.f32 %v4227_v58, %v1695_v22 }
 0x2f5   : > { %v1771_v49 = vmax.f32 %v1696_v34, 0.0 }
 0x2f6   : > { %v1535_v46 = vpop.f32.mrf.mxu0 }
 0x2f7   : > { %v1536_v36 = vadd.f32 %v4143_v27, %v1535_v46  ;;  %v1801_v53 = vpack.c.bf16 %v1771_v49, %v1770_v38 }
 0x2f9   : > { %v1584_v57 = vmax.f32 %v1536_v36, 0.0  ;;  %1893 = vmatmul.bf16.gmra.mxu2 %v1801_v53 }
 0x2fa   : > { %v1698_v56 = vpop.f32.mrf.mxu1 }
 0x2fb   : > { %v1605_v37 = vpack.c.bf16 %v1584_v57, %v1583_v54  ;;  %v1699_v21 = vadd.f32 %v4227_v58, %v1698_v56 }
 0x2fd   : > { %1737 = vmatmul.bf16.gmra.mxu1 %v1605_v37  ;;  %v1772_v2 = vmax.f32 %v1699_v21, 0.0 }
 0x2fe   : > { %v1538_v62 = vpop.f32.mrf.mxu0 }
 0x2ff   : > { %v1539_v4 = vadd.f32 %v4143_v27, %v1538_v62 }
 0x301   : > { %v1585_v13 = vmax.f32 %v1539_v4, 0.0 }
 0x302   : > { %v1700_v44 = vpop.f32.mrf.mxu1 }
 0x303   : > { %v1701_v50 = vadd.f32 %v4227_v58, %v1700_v44 }
 0x305   : > { %v1773_v23 = vmax.f32 %v1701_v50, 0.0 }
 0x306   : > { %v1540_v7 = vpop.f32.mrf.mxu0 }
 0x307   : > { %v1541_v12 = vadd.f32 %v4143_v27, %v1540_v7  ;;  %v1802_v55 = vpack.c.bf16 %v1773_v23, %v1772_v2 }
 0x309   : > { %v1586_v9 = vmax.f32 %v1541_v12, 0.0  ;;  %1898 = vmatmul.bf16.gmra.mxu2 %v1802_v55 }
 0x30a   : > { %v1703_v29 = vpop.f32.mrf.mxu1 }
 0x30b   : > { %v1606_v14 = vpack.c.bf16 %v1586_v9, %v1585_v13  ;;  %v1704_v16 = vadd.f32 %v4227_v58, %v1703_v29 }
 0x30d   : > { %1742 = vmatmul.bf16.gmra.mxu1 %v1606_v14  ;;  %v1774_v38 = vmax.f32 %v1704_v16, 0.0 }
 0x30e   : > { %v1543_v63 = vpop.f32.mrf.mxu0 }
 0x30f   : > { %v1544_v42 = vadd.f32 %v4143_v27, %v1543_v63 }
 0x311   : > { %v1587_v54 = vmax.f32 %v1544_v42, 0.0 }
 0x312   : > { %v1705_v22 = vpop.f32.mrf.mxu1 }
 0x313   : > { %v1706_v34 = vadd.f32 %v4227_v58, %v1705_v22 }
 0x315   : > { %v1775_v49 = vmax.f32 %v1706_v34, 0.0 }
 0x316   : > { %v1545_v46 = vpop.f32.mrf.mxu0 }
 0x317   : > { %v1546_v36 = vadd.f32 %v4143_v27, %v1545_v46  ;;  %v1803_v53 = vpack.c.bf16 %v1775_v49, %v1774_v38 }
 0x319   : > { %v1588_v57 = vmax.f32 %v1546_v36, 0.0  ;;  %1903 = vmatmul.bf16.gmra.mxu2 %v1803_v53 }
 0x31a   : > { %v1708_v56 = vpop.f32.mrf.mxu1 }
 0x31b   : > { %v1607_v37 = vpack.c.bf16 %v1588_v57, %v1587_v54  ;;  %v1709_v21 = vadd.f32 %v4227_v58, %v1708_v56 }
 0x31d   : > { %1747 = vmatmul.bf16.gmra.mxu1 %v1607_v37  ;;  %v1776_v2 = vmax.f32 %v1709_v21, 0.0 }
 0x31e   : > { %v1548_v62 = vpop.f32.mrf.mxu0 }
 0x31f   : > { %v1549_v4 = vadd.f32 %v4143_v27, %v1548_v62 }
 0x321   : > { %v1589_v13 = vmax.f32 %v1549_v4, 0.0 }
 0x322   : > { %v1710_v44 = vpop.f32.mrf.mxu1 }
 0x323   : > { %v1711_v50 = vadd.f32 %v4227_v58, %v1710_v44 }
 0x325   : > { %v1777_v23 = vmax.f32 %v1711_v50, 0.0 }
 0x326   : > { %v1550_v7 = vpop.f32.mrf.mxu0 }
 0x327   : > { %v1551_v12 = vadd.f32 %v4143_v27, %v1550_v7  ;;  %v1804_v55 = vpack.c.bf16 %v1777_v23, %v1776_v2 }
 0x329   : > { %v1590_v9 = vmax.f32 %v1551_v12, 0.0  ;;  %1908 = vmatmul.bf16.gmra.mxu2 %v1804_v55 }
 0x32a   : > { %v1713_v29 = vpop.f32.mrf.mxu1 }
 0x32b   : > { %v1608_v14 = vpack.c.bf16 %v1590_v9, %v1589_v13  ;;  %v1714_v16 = vadd.f32 %v4227_v58, %v1713_v29 }
 0x32d   : > { %1752 = vmatmul.bf16.gmra.mxu1 %v1608_v14  ;;  %v1778_v38 = vmax.f32 %v1714_v16, 0.0 }
 0x32e   : > { %v1553_v63 = vpop.f32.mrf.mxu0 }
 0x32f   : > { %v1554_v42 = vadd.f32 %v4143_v27, %v1553_v63 }
 0x331   : > { %v1591_v54 = vmax.f32 %v1554_v42, 0.0 }
 0x332   : > { %v1715_v22 = vpop.f32.mrf.mxu1 }
 0x333   : > { %v1716_v34 = vadd.f32 %v4227_v58, %v1715_v22 }
 0x335   : > { %v1779_v49 = vmax.f32 %v1716_v34, 0.0 }
 0x336   : > { %v1555_v46 = vpop.f32.mrf.mxu0 }
 0x337   : > { %v1556_v36 = vadd.f32 %v4143_v27, %v1555_v46  ;;  %v1805_v53 = vpack.c.bf16 %v1779_v49, %v1778_v38 }
 0x339   : > { %v1592_v57 = vmax.f32 %v1556_v36, 0.0  ;;  %1913 = vmatmul.bf16.gmra.mxu2 %v1805_v53 }
 0x33a   : > { %v1718_v56 = vpop.f32.mrf.mxu1 }
 0x33b   : > { %v1609_v37 = vpack.c.bf16 %v1592_v57, %v1591_v54  ;;  %v1719_v21 = vadd.f32 %v4227_v58, %v1718_v56 }
 0x33d   : > { %1757 = vmatmul.bf16.gmra.mxu1 %v1609_v37  ;;  %v1780_v2 = vmax.f32 %v1719_v21, 0.0  ;;  %v4290_v21 = vld [vmem:[%s4739_s15] ss:$0 sm:$0xff] }
 0x33e   : > { %v1558_v62 = vpop.f32.mrf.mxu0 }
 0x33f   : > { %v1559_v4 = vadd.f32 %v4143_v27, %v1558_v62 }
 0x341   : > { %v1593_v13 = vmax.f32 %v1559_v4, 0.0 }
 0x342   : > { %v1720_v44 = vpop.f32.mrf.mxu1 }
 0x343   : > { %v1721_v50 = vadd.f32 %v4227_v58, %v1720_v44 }
 0x345   : > { %v1781_v23 = vmax.f32 %v1721_v50, 0.0 }
 0x346   : > { %v1560_v7 = vpop.f32.mrf.mxu0 }
 0x347   : > { %v1561_v12 = vadd.f32 %v4143_v27, %v1560_v7  ;;  %v1806_v55 = vpack.c.bf16 %v1781_v23, %v1780_v2  ;;  %v3367_v27 = vld [vmem:[%s4732_s8 + $0x20] sm:$0xff] }
 0x348   : > { %2329 = vmatpush.bf16.msra.mxu0 %v3367_v27  ;;  %3387 = vmatpush.bf16.msrb.mxu2 %v3367_v27 }
 0x349   : > { %v1594_v9 = vmax.f32 %v1561_v12, 0.0  ;;  %1918 = vmatmul.bf16.gmra.mxu2 %v1806_v55 }
 0x34a   : > { %v1723_v29 = vpop.f32.mrf.mxu1 }
 0x34b   : > { %v1610_v14 = vpack.c.bf16 %v1594_v9, %v1593_v13  ;;  %v1724_v63 = vadd.f32 %v4227_v58, %v1723_v29  ;;  %v3366_v29 = vld [vmem:[%s4732_s8 + $0x18] sm:$0xff] }
 0x34c   : > { %2330 = vmatpush.bf16.msra.mxu0 %v3366_v29  ;;  %3388 = vmatpush.bf16.msrb.mxu2 %v3366_v29 }
 0x34d   : > { %1762 = vmatmul.bf16.gmra.mxu1 %v1610_v14  ;;  %v1782_v34 = vmax.f32 %v1724_v63, 0.0 }
 0x352   : > { %v1725_v16 = vpop.f32.mrf.mxu1 }
 0x353   : > { %v1726_v22 = vadd.f32 %v4227_v58, %v1725_v16 }
 0x355   : > { %v1783_v38 = vmax.f32 %v1726_v22, 0.0 }
 0x357   : > { %v1807_v42 = vpack.c.bf16 %v1783_v38, %v1782_v34  ;;  %v3378_v34 = vld [vmem:[%s4733_s9 + $0x38] sm:$0xff] }
 0x358   : > { %2531 = vmatpush.bf16.msra.mxu1 %v3378_v34 }
 0x359   : > { %1923 = vmatmul.bf16.gmra.mxu2 %v1807_v42 }
 0x35a   : > { %v1728_v49 = vpop.f32.mrf.mxu1 }
 0x35b   : > { %v1729_v39 = vadd.f32 %v4227_v58, %v1728_v49 }
 0x35d   : > { %v1784_v53 = vmax.f32 %v1729_v39, 0.0 }
 0x362   : > { %v1730_v46 = vpop.f32.mrf.mxu1 }
 0x363   : > { %v1731_v36 = vadd.f32 %v4227_v58, %v1730_v46 }
 0x365   : > { %v1785_v54 = vmax.f32 %v1731_v36, 0.0 }
 0x367   : > { %v1808_v57 = vpack.c.bf16 %v1785_v54, %v1784_v53 }
 0x369   : > { %1928 = vmatmul.bf16.gmra.mxu2 %v1808_v57 }
 0x36a   : > { %v1733_v56 = vpop.f32.mrf.mxu1 }
 0x36b   : > { %v1734_v59 = vadd.f32 %v4227_v58, %v1733_v56 }
 0x36c   : > { %v1889_v37 = vpop.f32.mrf.mxu2 }
 0x36d   : > { %v1890_v62 = vadd.f32 %v1889_v37, %v4129_v11  ;;  %v1786_v4 = vmax.f32 %v1734_v59, 0.0 }
 0x36f   : > { %v1973_v23 = vadd.f32 %v4290_v21, %v1890_v62 }
 0x371   : > { %v2005_v9 = vmax.f32 %v1973_v23, 0.0 }
 0x372   : > { %v1735_v44 = vpop.f32.mrf.mxu1 }
 0x373   : > { %v1736_v50 = vadd.f32 %v4227_v58, %v1735_v44 }
 0x374   : > { %v1891_v2 = vpop.f32.mrf.mxu2 }
 0x375   : > { %v1787_v7 = vmax.f32 %v1736_v50, 0.0  ;;  %v1892_v12 = vadd.f32 %v1891_v2, %v4131_v31 }
 0x377   : > { %v1974_v55 = vadd.f32 %v4290_v21, %v1892_v12  ;;  %v1809_v13 = vpack.c.bf16 %v1787_v7, %v1786_v4 }
 0x379   : > { %v2006_v11 = vmax.f32 %v1974_v55, 0.0  ;;  %1933 = vmatmul.bf16.gmra.mxu2 %v1809_v13 }
 0x37a   : > { %v1738_v14 = vpop.f32.mrf.mxu1 }
 0x37b   : > { %v2037_v63 = vpack.c.bf16 %v2006_v11, %v2005_v9  ;;  %v1739_v22 = vadd.f32 %v4227_v58, %v1738_v14 }
 0x37c   : > { %v1894_v16 = vpop.f32.mrf.mxu2 }
 0x37d   : > { %2129 = vmatmul.bf16.vlgmr.msra.gmra.mxu3 %v2037_v63  ;;  %v1895_v31 = vadd.f32 %v1894_v16, %v4138_v26  ;;  %v1788_v27 = vmax.f32 %v1739_v22, 0.0  ;;  %v3377_v22 = vld [vmem:[%s4733_s9 + $0x30] sm:$0xff] }
 0x37e   : > { %2532 = vmatpush.bf16.msra.mxu1 %v3377_v22 }
 0x37f   : > { %v1975_v39 = vadd.f32 %v4290_v21, %v1895_v31 }
 0x381   : > { %v2007_v57 = vmax.f32 %v1975_v39, 0.0 }
 0x382   : > { %v1740_v38 = vpop.f32.mrf.mxu1 }
 0x383   : > { %v1741_v42 = vadd.f32 %v4227_v58, %v1740_v38 }
 0x384   : > { %v1896_v49 = vpop.f32.mrf.mxu2 }
 0x385   : > { %v1789_v46 = vmax.f32 %v1741_v42, 0.0  ;;  %v1897_v36 = vadd.f32 %v1896_v49, %v4148_v30 }
 0x387   : > { %v1976_v53 = vadd.f32 %v4290_v21, %v1897_v36  ;;  %v1810_v54 = vpack.c.bf16 %v1789_v46, %v1788_v27 }
 0x389   : > { %v2008_v26 = vmax.f32 %v1976_v53, 0.0  ;;  %1938 = vmatmul.bf16.gmra.mxu2 %v1810_v54 }
 0x38a   : > { %v1743_v56 = vpop.f32.mrf.mxu1 }
 0x38b   : > { %v2038_v37 = vpack.c.bf16 %v2008_v26, %v2007_v57  ;;  %v1744_v62 = vadd.f32 %v4227_v58, %v1743_v56 }
 0x38c   : > { %v1899_v59 = vpop.f32.mrf.mxu2 }
 0x38d   : > { %2134 = vmatmul.bf16.gmra.mxu3 %v2038_v37  ;;  %v1900_v44 = vadd.f32 %v1899_v59, %v4154_v43  ;;  %v1790_v23 = vmax.f32 %v1744_v62, 0.0  ;;  %v3365_v43 = vld [vmem:[%s4732_s8 + $0x10] sm:$0xff] }
 0x38e   : > { %2331 = vmatpush.bf16.msra.mxu0 %v3365_v43  ;;  %3389 = vmatpush.bf16.msrb.mxu2 %v3365_v43  ;;  %v3376_v43 = vld [vmem:[%s4733_s9 + $0x28] sm:$0xff] }
 0x38f   : > { %v1977_v30 = vadd.f32 %v4290_v21, %v1900_v44  ;;  %2533 = vmatpush.bf16.msra.mxu1 %v3376_v43 }
 0x391   : > { %v2009_v9 = vmax.f32 %v1977_v30, 0.0 }
 0x392   : > { %v1745_v50 = vpop.f32.mrf.mxu1 }
 0x393   : > { %v1746_v2 = vadd.f32 %v4227_v58, %v1745_v50 }
 0x394   : > { %v1901_v4 = vpop.f32.mrf.mxu2 }
 0x395   : > { %v1791_v7 = vmax.f32 %v1746_v2, 0.0  ;;  %v1902_v12 = vadd.f32 %v1901_v4, %v4163_v51 }
 0x397   : > { %v1978_v55 = vadd.f32 %v4290_v21, %v1902_v12  ;;  %v1811_v13 = vpack.c.bf16 %v1791_v7, %v1790_v23 }
 0x399   : > { %v2010_v11 = vmax.f32 %v1978_v55, 0.0  ;;  %1943 = vmatmul.bf16.gmra.mxu2 %v1811_v13 }
 0x39a   : > { %v1748_v29 = vpop.f32.mrf.mxu1 }
 0x39b   : > { %v2039_v14 = vpack.c.bf16 %v2010_v11, %v2009_v9  ;;  %v1749_v16 = vadd.f32 %v4227_v58, %v1748_v29 }
 0x39c   : > { %v1904_v63 = vpop.f32.mrf.mxu2 }
 0x39d   : > { %2139 = vmatmul.bf16.gmra.mxu3 %v2039_v14  ;;  %v1905_v51 = vadd.f32 %v1904_v63, %v4167_v18  ;;  %v1792_v42 = vmax.f32 %v1749_v16, 0.0 }
 0x39f   : > { %v1979_v49 = vadd.f32 %v4290_v21, %v1905_v51 }
 0x3a1   : > { %v2011_v53 = vmax.f32 %v1979_v49, 0.0 }
 0x3a2   : > { %v1750_v31 = vpop.f32.mrf.mxu1 }
 0x3a3   : > { %v1751_v34 = vadd.f32 %v4227_v58, %v1750_v31 }
 0x3a4   : > { %v1906_v38 = vpop.f32.mrf.mxu2 }
 0x3a5   : > { %v1793_v27 = vmax.f32 %v1751_v34, 0.0  ;;  %v1907_v39 = vadd.f32 %v1906_v38, %v4174_v10 }
 0x3a7   : > { %v1980_v46 = vadd.f32 %v4290_v21, %v1907_v39  ;;  %v1812_v36 = vpack.c.bf16 %v1793_v27, %v1792_v42 }
 0x3a9   : > { %v2012_v18 = vmax.f32 %v1980_v46, 0.0  ;;  %1948 = vmatmul.bf16.gmra.mxu2 %v1812_v36 }
 0x3aa   : > { %v1753_v54 = vpop.f32.mrf.mxu1 }
 0x3ab   : > { %v2040_v57 = vpack.c.bf16 %v2012_v18, %v2011_v53  ;;  %v1754_v56 = vadd.f32 %v4227_v58, %v1753_v54 }
 0x3ac   : > { %v1909_v26 = vpop.f32.mrf.mxu2 }
 0x3ad   : > { %2144 = vmatmul.bf16.gmra.mxu3 %v2040_v57  ;;  %v1910_v37 = vadd.f32 %v1909_v26, %v4183_v60  ;;  %v1794_v50 = vmax.f32 %v1754_v56, 0.0  ;;  %v3364_v60 = vld [vmem:[%s4732_s8 + $0x8] sm:$0xff] }
 0x3ae   : > { %2332 = vmatpush.bf16.msra.mxu0 %v3364_v60  ;;  %3390 = vmatpush.bf16.msrb.mxu2 %v3364_v60 }
 0x3af   : > { %v1981_v10 = vadd.f32 %v4290_v21, %v1910_v37 }
 0x3b1   : > { %v2013_v7 = vmax.f32 %v1981_v10, 0.0 }
 0x3b2   : > { %v1755_v59 = vpop.f32.mrf.mxu1 }
 0x3b3   : > { %v1756_v62 = vadd.f32 %v4227_v58, %v1755_v59 }
 0x3b4   : > { %v1911_v44 = vpop.f32.mrf.mxu2 }
 0x3b5   : > { %v1795_v2 = vmax.f32 %v1756_v62, 0.0  ;;  %v1912_v4 = vadd.f32 %v1911_v44, %v4186_v8 }
 0x3b7   : > { %v1982_v23 = vadd.f32 %v4290_v21, %v1912_v4  ;;  %v1813_v30 = vpack.c.bf16 %v1795_v2, %v1794_v50 }
 0x3b9   : > { %v2014_v12 = vmax.f32 %v1982_v23, 0.0  ;;  %1953 = vmatmul.bf16.gmra.mxu2 %v1813_v30 }
 0x3ba   : > { %v1758_v55 = vpop.f32.mrf.mxu1 }
 0x3bb   : > { %v2041_v13 = vpack.c.bf16 %v2014_v12, %v2013_v7  ;;  %v1759_v11 = vadd.f32 %v4227_v58, %v1758_v55 }
 0x3bc   : > { %v1914_v9 = vpop.f32.mrf.mxu2 }
 0x3bd   : > { %2149 = vmatmul.bf16.gmra.mxu3 %v2041_v13  ;;  %v1915_v8 = vadd.f32 %v1914_v9, %v4194_v33  ;;  %v1796_v16 = vmax.f32 %v1759_v11, 0.0 }
 0x3bf   : > { %v1983_v51 = vadd.f32 %v4290_v21, %v1915_v8 }
 0x3c1   : > { %v2015_v42 = vmax.f32 %v1983_v51, 0.0  ;;  %v4368_v51 = vld [vmem:[%s4740_s16] ss:$0 sm:$0xff] }
 0x3c2   : > { %v1760_v29 = vpop.f32.mrf.mxu1 }
 0x3c3   : > { %v1761_v14 = vadd.f32 %v4227_v58, %v1760_v29 }
 0x3c4   : > { %v1916_v63 = vpop.f32.mrf.mxu2 }
 0x3c5   : > { %v1797_v22 = vmax.f32 %v1761_v14, 0.0  ;;  %v1917_v31 = vadd.f32 %v1916_v63, %v4202_v47 }
 0x3c7   : > { %v1984_v34 = vadd.f32 %v4290_v21, %v1917_v31  ;;  %v1814_v38 = vpack.c.bf16 %v1797_v22, %v1796_v16 }
 0x3c9   : > { %v2016_v33 = vmax.f32 %v1984_v34, 0.0  ;;  %1958 = vmatmul.bf16.gmra.mxu2 %v1814_v38 }
 0x3ca   : > { %v1763_v49 = vpop.f32.mrf.mxu1 }
 0x3cb   : > { %v2042_v27 = vpack.c.bf16 %v2016_v33, %v2015_v42  ;;  %v1764_v46 = vadd.f32 %v4227_v58, %v1763_v49 }
 0x3cc   : > { %v1919_v39 = vpop.f32.mrf.mxu2 }
 0x3cd   : > { %2154 = vmatmul.bf16.gmra.mxu3 %v2042_v27  ;;  %v1920_v36 = vadd.f32 %v1919_v39, %v4205_v17  ;;  %v1798_v57 = vmax.f32 %v1764_v46, 0.0  ;;  %v3363_v17 = vld [vmem:[%s4732_s8] sm:$0xff] }
 0x3ce   : > { %2333 = vmatpush.bf16.msra.mxu0 %v3363_v17  ;;  %3391 = vmatpush.bf16.msrb.mxu2 %v3363_v17 }
 0x3cf   : > { %v1985_v47 = vadd.f32 %v4290_v21, %v1920_v36 }
 0x3d1   : > { %v2017_v62 = vmax.f32 %v1985_v47, 0.0 }
 0x3d2   : > { %v1765_v53 = vpop.f32.mrf.mxu1 }
 0x3d3   : > { %v1766_v18 = vadd.f32 %v4227_v58, %v1765_v53 }
 0x3d4   : > { %v1921_v54 = vpop.f32.mrf.mxu2 }
 0x3d5   : > { %v1799_v26 = vmax.f32 %v1766_v18, 0.0  ;;  %v1922_v56 = vadd.f32 %v1921_v54, %v4214_v24  ;;  %v3375_v24 = vld [vmem:[%s4733_s9 + $0x20] sm:$0xff] }
 0x3d6   : > { %2534 = vmatpush.bf16.msra.mxu1 %v3375_v24 }
 0x3d7   : > { %v1986_v37 = vadd.f32 %v4290_v21, %v1922_v56  ;;  %v1815_v59 = vpack.c.bf16 %v1799_v26, %v1798_v57 }
 0x3d9   : > { %v2018_v44 = vmax.f32 %v1986_v37, 0.0  ;;  %1963 = vmatmul.bf16.gmra.mxu2 %v1815_v59 }
 0x3db   : > { %v2043_v50 = vpack.c.bf16 %v2018_v44, %v2017_v62 }
 0x3dc   : > { %v1924_v58 = vpop.f32.mrf.mxu2 }
 0x3dd   : > { %2159 = vmatmul.bf16.gmra.mxu3 %v2043_v50  ;;  %v1925_v10 = vadd.f32 %v1924_v58, %v4218_v52 }
 0x3df   : > { %v1987_v4 = vadd.f32 %v4290_v21, %v1925_v10 }
 0x3e1   : > { %v2019_v7 = vmax.f32 %v1987_v4, 0.0 }
 0x3e4   : > { %v1926_v2 = vpop.f32.mrf.mxu2 }
 0x3e5   : > { %v1927_v23 = vadd.f32 %v1926_v2, %v4220_v3 }
 0x3e7   : > { %v1988_v30 = vadd.f32 %v4290_v21, %v1927_v23 }
 0x3e9   : > { %v2020_v12 = vmax.f32 %v1988_v30, 0.0 }
 0x3eb   : > { %v2044_v60 = vpack.c.bf16 %v2020_v12, %v2019_v7 }
 0x3ec   : > { %v1929_v55 = vpop.f32.mrf.mxu2 }
 0x3ed   : > { %2164 = vmatmul.bf16.gmra.mxu3 %v2044_v60  ;;  %v1930_v13 = vadd.f32 %v1929_v55, %v3950_v19  ;;  %v3374_v19 = vld [vmem:[%s4733_s9 + $0x18] sm:$0xff] }
 0x3ee   : > { %2535 = vmatpush.bf16.msra.mxu1 %v3374_v19 }
 0x3ef   : > { %v1989_v9 = vadd.f32 %v4290_v21, %v1930_v13 }
 0x3f1   : > { %v2021_v43 = vmax.f32 %v1989_v9, 0.0 }
 0x3f4   : > { %v1931_v52 = vpop.f32.mrf.mxu2 }
 0x3f5   : > { %v1932_v11 = vadd.f32 %v1931_v52, %v3956_v28 }
 0x3f7   : > { %v1990_v8 = vadd.f32 %v4290_v21, %v1932_v11 }
 0x3f9   : > { %v2022_v29 = vmax.f32 %v1990_v8, 0.0 }
 0x3fb   : > { %v2045_v3 = vpack.c.bf16 %v2022_v29, %v2021_v43 }
 0x3fc   : > { %v1934_v14 = vpop.f32.mrf.mxu2 }
 0x3fd   : > { %2169 = vmatmul.bf16.gmra.mxu3 %v2045_v3  ;;  %v1935_v16 = vadd.f32 %v1934_v14, %v3971_v45 }
 0x3ff   : > { %v1991_v22 = vadd.f32 %v4290_v21, %v1935_v16 }
 0x400   : > { %v2130_v63 = vpop.f32.mrf.mxu3 }
 0x401   : > { %v2131_v34 = vadd.f32 %v4368_v51, %v2130_v63  ;;  %v2023_v42 = vmax.f32 %v1991_v22, 0.0 }
 0x403   : > { %v2210_v27 = vmax.f32 %v2131_v34, 0.0 }
 0x404   : > { %v1936_v28 = vpop.f32.mrf.mxu2 }
 0x405   : > { %v1937_v31 = vadd.f32 %v1936_v28, %v3974_v48 }
 0x407   : > { %v1992_v38 = vadd.f32 %v4290_v21, %v1937_v31 }
 0x408   : > { %v2132_v45 = vpop.f32.mrf.mxu3 }
 0x409   : > { %v2024_v33 = vmax.f32 %v1992_v38, 0.0  ;;  %v2133_v49 = vadd.f32 %v4368_v51, %v2132_v45 }
 0x40b   : > { %v2211_v39 = vmax.f32 %v2133_v49, 0.0  ;;  %v2046_v46 = vpack.c.bf16 %v2024_v33, %v2023_v42 }
 0x40c   : > { %v1939_v36 = vpop.f32.mrf.mxu2 }
 0x40d   : > { %v2242_v53 = vpack.c.bf16 %v2211_v39, %v2210_v27  ;;  %2174 = vmatmul.bf16.gmra.mxu3 %v2046_v46  ;;  %v1940_v48 = vadd.f32 %v1939_v36, %v3985_v1 }
 0x40f   : > { %2334 = vmatmul.bf16.vlgmr.msra.gmra.mxu0 %v2242_v53  ;;  %v1993_v57 = vadd.f32 %v4290_v21, %v1940_v48 }
 0x410   : > { %v2135_v18 = vpop.f32.mrf.mxu3 }
 0x411   : > { %v2136_v26 = vadd.f32 %v4368_v51, %v2135_v18  ;;  %v2025_v59 = vmax.f32 %v1993_v57, 0.0 }
 0x413   : > { %v2212_v17 = vmax.f32 %v2136_v26, 0.0 }
 0x414   : > { %v1941_v54 = vpop.f32.mrf.mxu2 }
 0x415   : > { %v1942_v47 = vadd.f32 %v1941_v54, %v3994_v5  ;;  %v3373_v5 = vld [vmem:[%s4733_s9 + $0x10] sm:$0xff] }
 0x416   : > { %2536 = vmatpush.bf16.msra.mxu1 %v3373_v5 }
 0x417   : > { %v1994_v56 = vadd.f32 %v4290_v21, %v1942_v47 }
 0x418   : > { %v2137_v37 = vpop.f32.mrf.mxu3 }
 0x419   : > { %v2026_v62 = vmax.f32 %v1994_v56, 0.0  ;;  %v2138_v44 = vadd.f32 %v4368_v51, %v2137_v37 }
 0x41b   : > { %v2213_v50 = vmax.f32 %v2138_v44, 0.0  ;;  %v2047_v58 = vpack.c.bf16 %v2026_v62, %v2025_v59 }
 0x41c   : > { %v1944_v10 = vpop.f32.mrf.mxu2 }
 0x41d   : > { %2179 = vmatmul.bf16.gmra.mxu3 %v2047_v58  ;;  %v2243_v1 = vpack.c.bf16 %v2213_v50, %v2212_v17  ;;  %v1945_v2 = vadd.f32 %v1944_v10, %v3998_v15 }
 0x41f   : > { %2339 = vmatmul.bf16.gmra.mxu0 %v2243_v1  ;;  %v1995_v23 = vadd.f32 %v4290_v21, %v1945_v2 }
 0x420   : > { %v2140_v24 = vpop.f32.mrf.mxu3 }
 0x421   : > { %v2141_v7 = vadd.f32 %v4368_v51, %v2140_v24  ;;  %v2027_v55 = vmax.f32 %v1995_v23, 0.0 }
 0x423   : > { %v2214_v15 = vmax.f32 %v2141_v7, 0.0 }
 0x424   : > { %v1946_v4 = vpop.f32.mrf.mxu2 }
 0x425   : > { %v1947_v30 = vadd.f32 %v1946_v4, %v4006_v32 }
 0x427   : > { %v1996_v12 = vadd.f32 %v4290_v21, %v1947_v30 }
 0x428   : > { %v2142_v60 = vpop.f32.mrf.mxu3 }
 0x429   : > { %v2028_v13 = vmax.f32 %v1996_v12, 0.0  ;;  %v2143_v52 = vadd.f32 %v4368_v51, %v2142_v60 }
 0x42b   : > { %v2215_v9 = vmax.f32 %v2143_v52, 0.0  ;;  %v2048_v11 = vpack.c.bf16 %v2028_v13, %v2027_v55 }
 0x42c   : > { %v1949_v8 = vpop.f32.mrf.mxu2 }
 0x42d   : > { %2184 = vmatmul.bf16.gmra.mxu3 %v2048_v11  ;;  %v2244_v43 = vpack.c.bf16 %v2215_v9, %v2214_v15  ;;  %v1950_v32 = vadd.f32 %v1949_v8, %v4015_v41 }
 0x42f   : > { %2344 = vmatmul.bf16.gmra.mxu0 %v2244_v43  ;;  %v1997_v14 = vadd.f32 %v4290_v21, %v1950_v32 }
 0x430   : > { %v2145_v29 = vpop.f32.mrf.mxu3 }
 0x431   : > { %v2146_v16 = vadd.f32 %v4368_v51, %v2145_v29  ;;  %v2029_v22 = vmax.f32 %v1997_v14, 0.0 }
 0x433   : > { %v2216_v38 = vmax.f32 %v2146_v16, 0.0 }
 0x434   : > { %v1951_v3 = vpop.f32.mrf.mxu2 }
 0x435   : > { %v1952_v63 = vadd.f32 %v1951_v3, %v4022_v61  ;;  %v3372_v61 = vld [vmem:[%s4733_s9 + $0x8] sm:$0xff] }
 0x436   : > { %2537 = vmatpush.bf16.msra.mxu1 %v3372_v61 }
 0x437   : > { %v1998_v19 = vadd.f32 %v4290_v21, %v1952_v63 }
 0x438   : > { %v2147_v28 = vpop.f32.mrf.mxu3 }
 0x439   : > { %v2030_v31 = vmax.f32 %v1998_v19, 0.0  ;;  %v2148_v34 = vadd.f32 %v4368_v51, %v2147_v28 }
 0x43b   : > { %v2217_v45 = vmax.f32 %v2148_v34, 0.0  ;;  %v2049_v42 = vpack.c.bf16 %v2030_v31, %v2029_v22 }
 0x43c   : > { %v1954_v33 = vpop.f32.mrf.mxu2 }
 0x43d   : > { %2189 = vmatmul.bf16.gmra.mxu3 %v2049_v42  ;;  %v2245_v41 = vpack.c.bf16 %v2217_v45, %v2216_v38  ;;  %v1955_v27 = vadd.f32 %v1954_v33, %v4029_v0 }
 0x43f   : > { %2349 = vmatmul.bf16.gmra.mxu0 %v2245_v41  ;;  %v1999_v46 = vadd.f32 %v4290_v21, %v1955_v27  ;;  %v4430_v27 = vld [vmem:[%s4741_s17] ss:$0 sm:$0xff] }
 0x440   : > { %v2150_v49 = vpop.f32.mrf.mxu3 }
 0x441   : > { %v2151_v53 = vadd.f32 %v4368_v51, %v2150_v49  ;;  %v2031_v54 = vmax.f32 %v1999_v46, 0.0 }
 0x443   : > { %v2218_v0 = vmax.f32 %v2151_v53, 0.0 }
 0x444   : > { %v1956_v39 = vpop.f32.mrf.mxu2 }
 0x445   : > { %v1957_v36 = vadd.f32 %v1956_v39, %v4035_v6 }
 0x447   : > { %v2000_v18 = vadd.f32 %v4290_v21, %v1957_v36 }
 0x448   : > { %v2152_v48 = vpop.f32.mrf.mxu3 }
 0x449   : > { %v2032_v57 = vmax.f32 %v2000_v18, 0.0  ;;  %v2153_v47 = vadd.f32 %v4368_v51, %v2152_v48 }
 0x44b   : > { %v2219_v26 = vmax.f32 %v2153_v47, 0.0  ;;  %v2050_v56 = vpack.c.bf16 %v2032_v57, %v2031_v54 }
 0x44c   : > { %v1959_v37 = vpop.f32.mrf.mxu2 }
 0x44d   : > { %v2246_v59 = vpack.c.bf16 %v2219_v26, %v2218_v0  ;;  %2194 = vmatmul.bf16.gmra.mxu3 %v2050_v56  ;;  %v1960_v6 = vadd.f32 %v1959_v37, %v4043_v20 }
 0x44f   : > { %2354 = vmatmul.bf16.gmra.mxu0 %v2246_v59  ;;  %v2001_v17 = vadd.f32 %v4290_v21, %v1960_v6 }
 0x450   : > { %v2155_v62 = vpop.f32.mrf.mxu3 }
 0x451   : > { %v2156_v58 = vadd.f32 %v4368_v51, %v2155_v62  ;;  %v2033_v24 = vmax.f32 %v2001_v17, 0.0 }
 0x453   : > { %v2220_v4 = vmax.f32 %v2156_v58, 0.0 }
 0x454   : > { %v1961_v44 = vpop.f32.mrf.mxu2 }
 0x455   : > { %v1962_v50 = vadd.f32 %v1961_v44, %v4048_v25  ;;  %v3371_v25 = vld [vmem:[%s4733_s9] sm:$0xff] }
 0x456   : > { %2538 = vmatpush.bf16.msra.mxu1 %v3371_v25 }
 0x457   : > { %v2002_v10 = vadd.f32 %v4290_v21, %v1962_v50 }
 0x458   : > { %v2157_v1 = vpop.f32.mrf.mxu3 }
 0x459   : > { %v2034_v2 = vmax.f32 %v2002_v10, 0.0  ;;  %v2158_v5 = vadd.f32 %v4368_v51, %v2157_v1 }
 0x45b   : > { %v2221_v23 = vmax.f32 %v2158_v5, 0.0  ;;  %v2051_v30 = vpack.c.bf16 %v2034_v2, %v2033_v24 }
 0x45c   : > { %v1964_v7 = vpop.f32.mrf.mxu2 }
 0x45d   : > { %v2247_v12 = vpack.c.bf16 %v2221_v23, %v2220_v4  ;;  %2199 = vmatmul.bf16.gmra.mxu3 %v2051_v30  ;;  %v1965_v60 = vadd.f32 %v1964_v7, %v4052_v35 }
 0x45f   : > { %2359 = vmatmul.bf16.gmra.mxu0 %v2247_v12  ;;  %v2003_v13 = vadd.f32 %v4290_v21, %v1965_v60 }
 0x460   : > { %v2160_v20 = vpop.f32.mrf.mxu3 }
 0x461   : > { %v2161_v15 = vadd.f32 %v4368_v51, %v2160_v20  ;;  %v2035_v8 = vmax.f32 %v2003_v13, 0.0 }
 0x463   : > { %v2222_v35 = vmax.f32 %v2161_v15, 0.0 }
 0x464   : > { %v1966_v55 = vpop.f32.mrf.mxu2 }
 0x465   : > { %v1967_v52 = vadd.f32 %v1966_v55, %v4056_v40 }
 0x467   : > { %v2004_v9 = vadd.f32 %v4290_v21, %v1967_v52 }
 0x468   : > { %v2162_v11 = vpop.f32.mrf.mxu3 }
 0x469   : > { %v2036_v43 = vmax.f32 %v2004_v9, 0.0  ;;  %v2163_v29 = vadd.f32 %v4368_v51, %v2162_v11 }
 0x46b   : > { %v2223_v32 = vmax.f32 %v2163_v29, 0.0  ;;  %v2052_v3 = vpack.c.bf16 %v2036_v43, %v2035_v8 }
 0x46d   : > { %v2248_v14 = vpack.c.bf16 %v2223_v32, %v2222_v35  ;;  %2204 = vmatmul.bf16.gmra.mxu3 %v2052_v3 }
 0x46f   : > { %2364 = vmatmul.bf16.gmra.mxu0 %v2248_v14 }
 0x470   : > { %v2165_v63 = vpop.f32.mrf.mxu3 }
 0x471   : > { %v2166_v16 = vadd.f32 %v4368_v51, %v2165_v63 }
 0x473   : > { %v2224_v28 = vmax.f32 %v2166_v16, 0.0 }
 0x478   : > { %v2167_v40 = vpop.f32.mrf.mxu3 }
 0x479   : > { %v2168_v19 = vadd.f32 %v4368_v51, %v2167_v40 }
 0x47b   : > { %v2225_v22 = vmax.f32 %v2168_v19, 0.0 }
 0x47d   : > { %v2249_v21 = vpack.c.bf16 %v2225_v22, %v2224_v28 }
 0x47f   : > { %2369 = vmatmul.bf16.gmra.mxu0 %v2249_v21 }
 0x480   : > { %v2170_v31 = vpop.f32.mrf.mxu3 }
 0x481   : > { %v2171_v34 = vadd.f32 %v4368_v51, %v2170_v31 }
 0x483   : > { %v2226_v42 = vmax.f32 %v2171_v34, 0.0 }
 0x488   : > { %v2172_v38 = vpop.f32.mrf.mxu3 }
 0x489   : > { %v2173_v45 = vadd.f32 %v4368_v51, %v2172_v38 }
 0x48b   : > { %v2227_v33 = vmax.f32 %v2173_v45, 0.0 }
 0x48c   : > { %v2335_v41 = vpop.f32.mrf.mxu0 }
 0x48d   : > { %v2250_v49 = vpack.c.bf16 %v2227_v33, %v2226_v42  ;;  %v2336_v39 = vadd.f32 %v4430_v27, %v2335_v41 }
 0x48f   : > { %2374 = vmatmul.bf16.gmra.mxu0 %v2250_v49  ;;  %v2415_v53 = vmax.f32 %v2336_v39, 0.0 }
 0x490   : > { %v2175_v61 = vpop.f32.mrf.mxu3 }
 0x491   : > { %v2176_v18 = vadd.f32 %v4368_v51, %v2175_v61 }
 0x493   : > { %v2228_v0 = vmax.f32 %v2176_v18, 0.0 }
 0x494   : > { %v2337_v46 = vpop.f32.mrf.mxu0 }
 0x495   : > { %v2338_v36 = vadd.f32 %v4430_v27, %v2337_v46 }
 0x497   : > { %v2416_v48 = vmax.f32 %v2338_v36, 0.0 }
 0x498   : > { %v2177_v54 = vpop.f32.mrf.mxu3 }
 0x499   : > { %v2447_v57 = vpack.c.bf16 %v2416_v48, %v2415_v53  ;;  %v2178_v47 = vadd.f32 %v4368_v51, %v2177_v54 }
 0x49b   : > { %v2229_v26 = vmax.f32 %v2178_v47, 0.0  ;;  %2539 = vmatmul.bf16.vlgmr.msra.gmra.mxu1 %v2447_v57 }
 0x49c   : > { %v2340_v56 = vpop.f32.mrf.mxu0 }
 0x49d   : > { %v2251_v37 = vpack.c.bf16 %v2229_v26, %v2228_v0  ;;  %v2341_v62 = vadd.f32 %v4430_v27, %v2340_v56 }
 0x49f   : > { %2379 = vmatmul.bf16.gmra.mxu0 %v2251_v37  ;;  %v2417_v17 = vmax.f32 %v2341_v62, 0.0 }
 0x4a0   : > { %v2180_v59 = vpop.f32.mrf.mxu3 }
 0x4a1   : > { %v2181_v50 = vadd.f32 %v4368_v51, %v2180_v59 }
 0x4a3   : > { %v2230_v2 = vmax.f32 %v2181_v50, 0.0 }
 0x4a4   : > { %v2342_v6 = vpop.f32.mrf.mxu0 }
 0x4a5   : > { %v2343_v44 = vadd.f32 %v4430_v27, %v2342_v6 }
 0x4a7   : > { %v2418_v58 = vmax.f32 %v2343_v44, 0.0 }
 0x4a8   : > { %v2182_v10 = vpop.f32.mrf.mxu3 }
 0x4a9   : > { %v2183_v1 = vadd.f32 %v4368_v51, %v2182_v10  ;;  %v2448_v24 = vpack.c.bf16 %v2418_v58, %v2417_v17 }
 0x4ab   : > { %v2231_v5 = vmax.f32 %v2183_v1, 0.0  ;;  %2544 = vmatmul.bf16.gmra.mxu1 %v2448_v24 }
 0x4ac   : > { %v2345_v4 = vpop.f32.mrf.mxu0 }
 0x4ad   : > { %v2252_v23 = vpack.c.bf16 %v2231_v5, %v2230_v2  ;;  %v2346_v7 = vadd.f32 %v4430_v27, %v2345_v4 }
 0x4af   : > { %2384 = vmatmul.bf16.gmra.mxu0 %v2252_v23  ;;  %v2419_v60 = vmax.f32 %v2346_v7, 0.0 }
 0x4b0   : > { %v2185_v30 = vpop.f32.mrf.mxu3 }
 0x4b1   : > { %v2186_v25 = vadd.f32 %v4368_v51, %v2185_v30 }
 0x4b3   : > { %v2232_v9 = vmax.f32 %v2186_v25, 0.0 }
 0x4b4   : > { %v2347_v12 = vpop.f32.mrf.mxu0 }
 0x4b5   : > { %v2348_v20 = vadd.f32 %v4430_v27, %v2347_v12 }
 0x4b7   : > { %v2420_v55 = vmax.f32 %v2348_v20, 0.0 }
 0x4b8   : > { %v2187_v13 = vpop.f32.mrf.mxu3 }
 0x4b9   : > { %v2188_v52 = vadd.f32 %v4368_v51, %v2187_v13  ;;  %v2449_v15 = vpack.c.bf16 %v2420_v55, %v2419_v60 }
 0x4bb   : > { %v2233_v11 = vmax.f32 %v2188_v52, 0.0  ;;  %2549 = vmatmul.bf16.gmra.mxu1 %v2449_v15 }
 0x4bc   : > { %v2350_v8 = vpop.f32.mrf.mxu0 }
 0x4bd   : > { %v2253_v43 = vpack.c.bf16 %v2233_v11, %v2232_v9  ;;  %v2351_v35 = vadd.f32 %v4430_v27, %v2350_v8 }
 0x4bf   : > { %2389 = vmatmul.bf16.gmra.mxu0 %v2253_v43  ;;  %v2421_v14 = vmax.f32 %v2351_v35, 0.0 }
 0x4c0   : > { %v2190_v29 = vpop.f32.mrf.mxu3 }
 0x4c1   : > { %v2191_v63 = vadd.f32 %v4368_v51, %v2190_v29 }
 0x4c3   : > { %v2234_v22 = vmax.f32 %v2191_v63, 0.0 }
 0x4c4   : > { %v2352_v32 = vpop.f32.mrf.mxu0 }
 0x4c5   : > { %v2353_v3 = vadd.f32 %v4430_v27, %v2352_v32 }
 0x4c7   : > { %v2422_v16 = vmax.f32 %v2353_v3, 0.0  ;;  %v4468_v3 = vld [vmem:[%s4742_s18] ss:$0 sm:$0xff] }
 0x4c8   : > { %v2192_v40 = vpop.f32.mrf.mxu3 }
 0x4c9   : > { %v2450_v19 = vpack.c.bf16 %v2422_v16, %v2421_v14  ;;  %v2193_v28 = vadd.f32 %v4368_v51, %v2192_v40 }
 0x4cb   : > { %v2235_v21 = vmax.f32 %v2193_v28, 0.0  ;;  %2554 = vmatmul.bf16.gmra.mxu1 %v2450_v19 }
 0x4cc   : > { %v2355_v31 = vpop.f32.mrf.mxu0 }
 0x4cd   : > { %v2254_v34 = vpack.c.bf16 %v2235_v21, %v2234_v22  ;;  %v2356_v45 = vadd.f32 %v4430_v27, %v2355_v31 }
 0x4cf   : > { %2394 = vmatmul.bf16.gmra.mxu0 %v2254_v34  ;;  %v2423_v41 = vmax.f32 %v2356_v45, 0.0 }
 0x4d0   : > { %v2195_v38 = vpop.f32.mrf.mxu3 }
 0x4d1   : > { %v2196_v49 = vadd.f32 %v4368_v51, %v2195_v38 }
 0x4d3   : > { %v2236_v53 = vmax.f32 %v2196_v49, 0.0 }
 0x4d4   : > { %v2357_v42 = vpop.f32.mrf.mxu0 }
 0x4d5   : > { %v2358_v33 = vadd.f32 %v4430_v27, %v2357_v42 }
 0x4d7   : > { %v2424_v61 = vmax.f32 %v2358_v33, 0.0 }
 0x4d8   : > { %v2197_v39 = vpop.f32.mrf.mxu3 }
 0x4d9   : > { %v2451_v46 = vpack.c.bf16 %v2424_v61, %v2423_v41  ;;  %v2198_v36 = vadd.f32 %v4368_v51, %v2197_v39 }
 0x4db   : > { %v2237_v18 = vmax.f32 %v2198_v36, 0.0  ;;  %2559 = vmatmul.bf16.gmra.mxu1 %v2451_v46 }
 0x4dc   : > { %v2360_v48 = vpop.f32.mrf.mxu0 }
 0x4dd   : > { %v2255_v54 = vpack.c.bf16 %v2237_v18, %v2236_v53  ;;  %v2361_v47 = vadd.f32 %v4430_v27, %v2360_v48 }
 0x4df   : > { %2399 = vmatmul.bf16.gmra.mxu0 %v2255_v54  ;;  %v2425_v56 = vmax.f32 %v2361_v47, 0.0 }
 0x4e0   : > { %v2200_v57 = vpop.f32.mrf.mxu3 }
 0x4e1   : > { %v2201_v37 = vadd.f32 %v4368_v51, %v2200_v57 }
 0x4e3   : > { %v2238_v17 = vmax.f32 %v2201_v37, 0.0 }
 0x4e4   : > { %v2362_v0 = vpop.f32.mrf.mxu0 }
 0x4e5   : > { %v2363_v26 = vadd.f32 %v4430_v27, %v2362_v0 }
 0x4e7   : > { %v2426_v59 = vmax.f32 %v2363_v26, 0.0 }
 0x4e8   : > { %v2202_v62 = vpop.f32.mrf.mxu3 }
 0x4e9   : > { %v2452_v6 = vpack.c.bf16 %v2426_v59, %v2425_v56  ;;  %v2203_v44 = vadd.f32 %v4368_v51, %v2202_v62 }
 0x4eb   : > { %v2239_v50 = vmax.f32 %v2203_v44, 0.0  ;;  %2564 = vmatmul.bf16.gmra.mxu1 %v2452_v6 }
 0x4ec   : > { %v2365_v58 = vpop.f32.mrf.mxu0 }
 0x4ed   : > { %v2256_v10 = vpack.c.bf16 %v2239_v50, %v2238_v17  ;;  %v2366_v24 = vadd.f32 %v4430_v27, %v2365_v58 }
 0x4ef   : > { %2404 = vmatmul.bf16.gmra.mxu0 %v2256_v10  ;;  %v2427_v4 = vmax.f32 %v2366_v24, 0.0 }
 0x4f0   : > { %v2205_v1 = vpop.f32.mrf.mxu3 }
 0x4f1   : > { %v2206_v23 = vadd.f32 %v4368_v51, %v2205_v1 }
 0x4f3   : > { %v2240_v60 = vmax.f32 %v2206_v23, 0.0 }
 0x4f4   : > { %v2367_v2 = vpop.f32.mrf.mxu0 }
 0x4f5   : > { %v2368_v5 = vadd.f32 %v4430_v27, %v2367_v2 }
 0x4f7   : > { %v2428_v30 = vmax.f32 %v2368_v5, 0.0 }
 0x4f8   : > { %v2207_v7 = vpop.f32.mrf.mxu3 }
 0x4f9   : > { %v2453_v12 = vpack.c.bf16 %v2428_v30, %v2427_v4  ;;  %v2208_v20 = vadd.f32 %v4368_v51, %v2207_v7 }
 0x4fb   : > { %v2241_v25 = vmax.f32 %v2208_v20, 0.0  ;;  %2569 = vmatmul.bf16.gmra.mxu1 %v2453_v12 }
 0x4fc   : > { %v2370_v55 = vpop.f32.mrf.mxu0 }
 0x4fd   : > { %v2257_v13 = vpack.c.bf16 %v2241_v25, %v2240_v60  ;;  %v2371_v52 = vadd.f32 %v4430_v27, %v2370_v55 }
 0x4ff   : > { %2409 = vmatmul.bf16.vlgmr.msrb.gmra.mxu2 %v2257_v13  ;;  %v2429_v11 = vmax.f32 %v2371_v52, 0.0 }
 0x504   : > { %v2372_v15 = vpop.f32.mrf.mxu0 }
 0x505   : > { %v2373_v9 = vadd.f32 %v4430_v27, %v2372_v15 }
 0x507   : > { %v2430_v8 = vmax.f32 %v2373_v9, 0.0 }
 0x509   : > { %v2454_v43 = vpack.c.bf16 %v2430_v8, %v2429_v11 }
 0x50b   : > { %2574 = vmatmul.bf16.gmra.mxu1 %v2454_v43 }
 0x50c   : > { %v2375_v29 = vpop.f32.mrf.mxu0 }
 0x50d   : > { %v2376_v35 = vadd.f32 %v4430_v27, %v2375_v29 }
 0x50f   : > { %v2431_v14 = vmax.f32 %v2376_v35, 0.0 }
 0x514   : > { %v2377_v51 = vpop.f32.mrf.mxu0 }
 0x515   : > { %v2378_v32 = vadd.f32 %v4430_v27, %v2377_v51 }
 0x517   : > { %v2432_v63 = vmax.f32 %v2378_v32, 0.0 }
 0x518   : > { %v2540_v16 = vpop.f32.mrf.mxu1 }
 0x519   : > { %v2455_v40 = vpack.c.bf16 %v2432_v63, %v2431_v14  ;;  %v2541_v19 = vadd.f32 %v4468_v3, %v2540_v16 }
 0x51b   : > { %2621 = vst.msk [vmem:[%s4471_s20] sm:$0xff] %vm2620_vm1, %v2541_v19  ;;  %2579 = vmatmul.bf16.gmra.mxu1 %v2455_v40 }
 0x51c   : > { %v2380_v28 = vpop.f32.mrf.mxu0 }
 0x51d   : > { %v2381_v31 = vadd.f32 %v4430_v27, %v2380_v28 }
 0x51f   : > { %v2433_v45 = vmax.f32 %v2381_v31, 0.0 }
 0x520   : > { %v2542_v22 = vpop.f32.mrf.mxu1 }
 0x521   : > { %v2543_v21 = vadd.f32 %v4468_v3, %v2542_v22 }
 0x523   : > { %2622 = vst.msk [vmem:[%s4471_s20 + $0x8] sm:$0xff] %vm2620_vm1, %v2543_v21 }
 0x524   : > { %v2382_v34 = vpop.f32.mrf.mxu0 }
 0x525   : > { %v2383_v38 = vadd.f32 %v4430_v27, %v2382_v34 }
 0x527   : > { %v2434_v42 = vmax.f32 %v2383_v38, 0.0 }
 0x528   : > { %v2545_v33 = vpop.f32.mrf.mxu1 }
 0x529   : > { %v2456_v41 = vpack.c.bf16 %v2434_v42, %v2433_v45  ;;  %v2546_v49 = vadd.f32 %v4468_v3, %v2545_v33 }
 0x52b   : > { %2623 = vst.msk [vmem:[%s4471_s20 + $0x10] sm:$0xff] %vm2620_vm1, %v2546_v49  ;;  %2584 = vmatmul.bf16.gmra.mxu1 %v2456_v41 }
 0x52c   : > { %v2385_v61 = vpop.f32.mrf.mxu0 }
 0x52d   : > { %v2386_v36 = vadd.f32 %v4430_v27, %v2385_v61 }
 0x52f   : > { %v2435_v48 = vmax.f32 %v2386_v36, 0.0 }
 0x530   : > { %v2547_v39 = vpop.f32.mrf.mxu1 }
 0x531   : > { %v2548_v46 = vadd.f32 %v4468_v3, %v2547_v39 }
 0x533   : > { %2624 = vst.msk [vmem:[%s4471_s20 + $0x18] sm:$0xff] %vm2620_vm1, %v2548_v46 }
 0x534   : > { %v2387_v53 = vpop.f32.mrf.mxu0 }
 0x535   : > { %v2388_v18 = vadd.f32 %v4430_v27, %v2387_v53 }
 0x537   : > { %v2436_v54 = vmax.f32 %v2388_v18, 0.0 }
 0x538   : > { %v2550_v57 = vpop.f32.mrf.mxu1 }
 0x539   : > { %v2457_v47 = vpack.c.bf16 %v2436_v54, %v2435_v48  ;;  %v2551_v0 = vadd.f32 %v4468_v3, %v2550_v57 }
 0x53b   : > { %2625 = vst.msk [vmem:[%s4471_s20 + $0x20] sm:$0xff] %vm2620_vm1, %v2551_v0  ;;  %2589 = vmatmul.bf16.gmra.mxu1 %v2457_v47 }
 0x53c   : > { %v2390_v26 = vpop.f32.mrf.mxu0 }
 0x53d   : > { %v2391_v59 = vadd.f32 %v4430_v27, %v2390_v26 }
 0x53f   : > { %v2437_v44 = vmax.f32 %v2391_v59, 0.0 }
 0x540   : > { %v2552_v56 = vpop.f32.mrf.mxu1 }
 0x541   : > { %v2553_v37 = vadd.f32 %v4468_v3, %v2552_v56 }
 0x543   : > { %2626 = vst.msk [vmem:[%s4471_s20 + $0x28] sm:$0xff] %vm2620_vm1, %v2553_v37 }
 0x544   : > { %v2392_v62 = vpop.f32.mrf.mxu0 }
 0x545   : > { %v2393_v6 = vadd.f32 %v4430_v27, %v2392_v62 }
 0x547   : > { %v2438_v17 = vmax.f32 %v2393_v6, 0.0 }
 0x548   : > { %v2555_v50 = vpop.f32.mrf.mxu1 }
 0x549   : > { %v2458_v58 = vpack.c.bf16 %v2438_v17, %v2437_v44  ;;  %v2556_v10 = vadd.f32 %v4468_v3, %v2555_v50 }
 0x54b   : > { %2627 = vst.msk [vmem:[%s4471_s20 + $0x30] sm:$0xff] %vm2620_vm1, %v2556_v10  ;;  %2594 = vmatmul.bf16.gmra.mxu1 %v2458_v58 }
 0x54c   : > { %v2395_v1 = vpop.f32.mrf.mxu0 }
 0x54d   : > { %v2396_v5 = vadd.f32 %v4430_v27, %v2395_v1 }
 0x54f   : > { %v2439_v30 = vmax.f32 %v2396_v5, 0.0 }
 0x550   : > { %v2557_v24 = vpop.f32.mrf.mxu1 }
 0x551   : > { %v2558_v2 = vadd.f32 %v4468_v3, %v2557_v24 }
 0x553   : > { %2628 = vst.msk [vmem:[%s4471_s20 + $0x38] sm:$0xff] %vm2620_vm1, %v2558_v2 }
 0x554   : > { %v2397_v4 = vpop.f32.mrf.mxu0 }
 0x555   : > { %v2398_v23 = vadd.f32 %v4430_v27, %v2397_v4 }
 0x557   : > { %v2440_v7 = vmax.f32 %v2398_v23, 0.0 }
 0x558   : > { %v2560_v12 = vpop.f32.mrf.mxu1 }
 0x559   : > { %v2459_v20 = vpack.c.bf16 %v2440_v7, %v2439_v30  ;;  %v2561_v60 = vadd.f32 %v4468_v3, %v2560_v12 }
 0x55b   : > { %2629 = vst.msk [vmem:[%s4471_s20 + $0x40] sm:$0xff] %vm2620_vm1, %v2561_v60  ;;  %2599 = vmatmul.bf16.gmra.mxu1 %v2459_v20 }
 0x55c   : > { %v2400_v25 = vpop.f32.mrf.mxu0 }
 0x55d   : > { %v2401_v52 = vadd.f32 %v4430_v27, %v2400_v25 }
 0x55f   : > { %v2441_v11 = vmax.f32 %v2401_v52, 0.0 }
 0x560   : > { %v2562_v55 = vpop.f32.mrf.mxu1 }
 0x561   : > { %v2563_v13 = vadd.f32 %v4468_v3, %v2562_v55 }
 0x563   : > { %2630 = vst.msk [vmem:[%s4471_s20 + $0x48] sm:$0xff] %vm2620_vm1, %v2563_v13 }
 0x564   : > { %v2402_v15 = vpop.f32.mrf.mxu0 }
 0x565   : > { %v2403_v9 = vadd.f32 %v4430_v27, %v2402_v15 }
 0x567   : > { %v2442_v8 = vmax.f32 %v2403_v9, 0.0 }
 0x568   : > { %v2565_v43 = vpop.f32.mrf.mxu1 }
 0x569   : > { %v2460_v29 = vpack.c.bf16 %v2442_v8, %v2441_v11  ;;  %v2566_v35 = vadd.f32 %v4468_v3, %v2565_v43 }
 0x56b   : > { %2631 = vst.msk [vmem:[%s4471_s20 + $0x50] sm:$0xff] %vm2620_vm1, %v2566_v35  ;;  %2604 = vmatmul.bf16.gmra.mxu1 %v2460_v29 }
 0x56c   : > { %v2405_v51 = vpop.f32.mrf.mxu0 }
 0x56d   : > { %v2406_v63 = vadd.f32 %v4430_v27, %v2405_v51 }
 0x56f   : > { %v2443_v19 = vmax.f32 %v2406_v63, 0.0 }
 0x570   : > { %v2567_v32 = vpop.f32.mrf.mxu1 }
 0x571   : > { %v2568_v14 = vadd.f32 %v4468_v3, %v2567_v32 }
 0x573   : > { %2632 = vst.msk [vmem:[%s4471_s20 + $0x58] sm:$0xff] %vm2620_vm1, %v2568_v14 }
 0x574   : > { %v2407_v16 = vpop.f32.mrf.mxu0 }
 0x575   : > { %v2408_v40 = vadd.f32 %v4430_v27, %v2407_v16 }
 0x577   : > { %v2444_v28 = vmax.f32 %v2408_v40, 0.0 }
 0x578   : > { %v2570_v22 = vpop.f32.mrf.mxu1 }
 0x579   : > { %v2461_v21 = vpack.c.bf16 %v2444_v28, %v2443_v19  ;;  %v2571_v31 = vadd.f32 %v4468_v3, %v2570_v22 }
 0x57b   : > { %2633 = vst.msk [vmem:[%s4471_s20 + $0x60] sm:$0xff] %vm2620_vm1, %v2571_v31  ;;  %2609 = vmatmul.bf16.gmra.mxu1 %v2461_v21 }
 0x580   : > { %v2572_v34 = vpop.f32.mrf.mxu1 }
 0x581   : > { %v2573_v38 = vadd.f32 %v4468_v3, %v2572_v34 }
 0x582   : > { %v2410_v45 = vpop.f32.mrf.mxu2 }
 0x583   : > { %2634 = vst.msk [vmem:[%s4471_s20 + $0x68] sm:$0xff] %vm2620_vm1, %v2573_v38  ;;  %v2411_v33 = vadd.f32 %v4430_v27, %v2410_v45 }
 0x585   : > { %v2445_v39 = vmax.f32 %v2411_v33, 0.0 }
 0x588   : > { %v2575_v42 = vpop.f32.mrf.mxu1 }
 0x589   : > { %v2576_v41 = vadd.f32 %v4468_v3, %v2575_v42 }
 0x58a   : > { %v2412_v49 = vpop.f32.mrf.mxu2 }
 0x58b   : > { %2635 = vst.msk [vmem:[%s4471_s20 + $0x70] sm:$0xff] %vm2620_vm1, %v2576_v41  ;;  %v2413_v61 = vadd.f32 %v4430_v27, %v2412_v49 }
 0x58d   : > { %v2446_v46 = vmax.f32 %v2413_v61, 0.0 }
 0x58f   : > { %v2462_v36 = vpack.c.bf16 %v2446_v46, %v2445_v39 }
 0x590   : > { %v2577_v53 = vpop.f32.mrf.mxu1 }
 0x591   : > { %v2578_v18 = vadd.f32 %v4468_v3, %v2577_v53  ;;  %2614 = vmatmul.bf16.gmra.mxu1 %v2462_v36 }
 0x593   : > { %2636 = vst.msk [vmem:[%s4471_s20 + $0x78] sm:$0xff] %vm2620_vm1, %v2578_v18 }
 0x598   : > { %v2580_v48 = vpop.f32.mrf.mxu1 }
 0x599   : > { %v2581_v54 = vadd.f32 %v4468_v3, %v2580_v48 }
 0x59b   : > { %2637 = vst.msk [vmem:[%s4471_s20 + $0x80] sm:$0xff] %vm2620_vm1, %v2581_v54 }
 0x5a0   : > { %v2582_v57 = vpop.f32.mrf.mxu1 }
 0x5a1   : > { %v2583_v27 = vadd.f32 %v4468_v3, %v2582_v57 }
 0x5a3   : > { %2638 = vst.msk [vmem:[%s4471_s20 + $0x88] sm:$0xff] %vm2620_vm1, %v2583_v27 }
 0x5a8   : > { %v2585_v47 = vpop.f32.mrf.mxu1 }
 0x5a9   : > { %v2586_v0 = vadd.f32 %v4468_v3, %v2585_v47 }
 0x5ab   : > { %2639 = vst.msk [vmem:[%s4471_s20 + $0x90] sm:$0xff] %vm2620_vm1, %v2586_v0 }
 0x5b0   : > { %v2587_v26 = vpop.f32.mrf.mxu1 }
 0x5b1   : > { %v2588_v56 = vadd.f32 %v4468_v3, %v2587_v26 }
 0x5b3   : > { %2640 = vst.msk [vmem:[%s4471_s20 + $0x98] sm:$0xff] %vm2620_vm1, %v2588_v56 }
 0x5b8   : > { %v2590_v37 = vpop.f32.mrf.mxu1 }
 0x5b9   : > { %v2591_v59 = vadd.f32 %v4468_v3, %v2590_v37 }
 0x5bb   : > { %2641 = vst.msk [vmem:[%s4471_s20 + $0xa0] sm:$0xff] %vm2620_vm1, %v2591_v59 }
 0x5c0   : > { %v2592_v62 = vpop.f32.mrf.mxu1 }
 0x5c1   : > { %v2593_v6 = vadd.f32 %v4468_v3, %v2592_v62 }
 0x5c3   : > { %2642 = vst.msk [vmem:[%s4471_s20 + $0xa8] sm:$0xff] %vm2620_vm1, %v2593_v6 }
 0x5c8   : > { %v2595_v44 = vpop.f32.mrf.mxu1 }
 0x5c9   : > { %v2596_v17 = vadd.f32 %v4468_v3, %v2595_v44 }
 0x5cb   : > { %2643 = vst.msk [vmem:[%s4471_s20 + $0xb0] sm:$0xff] %vm2620_vm1, %v2596_v17 }
 0x5d0   : > { %v2597_v50 = vpop.f32.mrf.mxu1 }
 0x5d1   : > { %v2598_v58 = vadd.f32 %v4468_v3, %v2597_v50 }
 0x5d3   : > { %2644 = vst.msk [vmem:[%s4471_s20 + $0xb8] sm:$0xff] %vm2620_vm1, %v2598_v58 }
 0x5d8   : > { %v2600_v10 = vpop.f32.mrf.mxu1 }
 0x5d9   : > { %v2601_v1 = vadd.f32 %v4468_v3, %v2600_v10 }
 0x5db   : > { %2645 = vst.msk [vmem:[%s4471_s20 + $0xc0] sm:$0xff] %vm2620_vm1, %v2601_v1 }
 0x5e0   : > { %v2602_v24 = vpop.f32.mrf.mxu1 }
 0x5e1   : > { %v2603_v2 = vadd.f32 %v4468_v3, %v2602_v24 }
 0x5e3   : > { %2646 = vst.msk [vmem:[%s4471_s20 + $0xc8] sm:$0xff] %vm2620_vm1, %v2603_v2 }
 0x5e8   : > { %v2605_v5 = vpop.f32.mrf.mxu1 }
 0x5e9   : > { %v2606_v4 = vadd.f32 %v4468_v3, %v2605_v5 }
 0x5eb   : > { %2647 = vst.msk [vmem:[%s4471_s20 + $0xd0] sm:$0xff] %vm2620_vm1, %v2606_v4 }
 0x5f0   : > { %v2607_v23 = vpop.f32.mrf.mxu1 }
 0x5f1   : > { %v2608_v30 = vadd.f32 %v4468_v3, %v2607_v23 }
 0x5f3   : > { %2648 = vst.msk [vmem:[%s4471_s20 + $0xd8] sm:$0xff] %vm2620_vm1, %v2608_v30 }
 0x5f8   : > { %v2610_v7 = vpop.f32.mrf.mxu1 }
 0x5f9   : > { %v2611_v12 = vadd.f32 %v4468_v3, %v2610_v7 }
 0x5fb   : > { %2649 = vst.msk [vmem:[%s4471_s20 + $0xe0] sm:$0xff] %vm2620_vm1, %v2611_v12 }
 0x600   : > { %v2612_v20 = vpop.f32.mrf.mxu1 }
 0x601   : > { %v2613_v60 = vadd.f32 %v4468_v3, %v2612_v20 }
 0x603   : > { %2650 = vst.msk [vmem:[%s4471_s20 + $0xe8] sm:$0xff] %vm2620_vm1, %v2613_v60 }
 0x60e   : > { %v2615_v25 = vpop.f32.mrf.mxu1 }
 0x60f   : > { %v2616_v55 = vadd.f32 %v4468_v3, %v2615_v25 }
 0x611   : > { %2651 = vst.msk [vmem:[%s4471_s20 + $0xf0] sm:$0xff] %vm2620_vm1, %v2616_v55 }
 0x615   : > { %2659 = sbr.rel (!%p3702_p4) target bundleno = 1626 (0x65a), region = 100 }
 0x616   : > { %v2617_v13 = vpop.f32.mrf.mxu1 }
 0x617   : > { %v2618_v52 = vadd.f32 %v4468_v3, %v2617_v13 }
 0x619   : > { %2652 = vst.msk [vmem:[%s4471_s20 + $0xf8] sm:$0xff] %vm2620_vm1, %v2618_v52 }
 0x61a   : > { %s4780_s0 = smov (!%p2662_p8, %s2661_s0), 32 }
 0x61b   : > { %s3298_s28 = sshll.u32 %s4780_s0, 3 }
 0x61c   : > { %p3301_p9 = scmp.eq.s32.totalorder %s3298_s28, 0 }
 0x61d   : > { %s4595_s22 = sshrl.u32 (!%p3301_p9), %s4780_s0, 5 }
 0x61e   : > { %2670 = sbr.rel (%p3301_p9) target bundleno = 1626 (0x65a), region = 104  ;;  %p3302_p10 = scmp.le.s32.totalorder (!%p3301_p9), %s4595_s22, 0 }
 0x623   : > { %2949 = sbr.rel (%p3302_p10) target bundleno = 1609 (0x649), region = 180  ;;  %s4771_s21 = smov (!%p3302_p10), %s4589_s1 }
 0x624   : > { %s4772_s24 = smov (!%p3302_p10), %s4471_s20  ;;  %s4604_s29 = smov (!%p3302_p10), 0  }
 0x625   : > { %s4606_s2 = smov (!%p3302_p10), 0  }
 0x628 LB: >> { %v2795_v3 = vld [vmem:[%s3551_s24] sm:$0xff]  ;;  %v2797_v15 = vld [vmem:[%s3551_s24 + $0x8] sm:$0xff]  ;;  %v2799_v9 = vld [vmem:[%s3551_s24 + $0x10] sm:$0xff]  ;;  %s2859_s25 = sadd.s32 1, %s3555_s29  ;;  %s2789_s2 = sadd.s32 1, %s3559_s2   ;;  %s3559_s2 = sphi %s4606_s2, %s2789_s2   ;;  %s3555_s29 = sphi %s4604_s29, %s4775_s29   ;;  %s3551_s24 = sphi %s4772_s24, %s4774_s24   ;;  %s3547_s21 = sphi %s4771_s21, %s4773_s21  }
 0x629   : >> { %2796 = vst [vmem:[%s3547_s21] sm:$0xff] %v2795_v3  ;;  %v2801_v11 = vld [vmem:[%s3551_s24 + $0x18] sm:$0xff]  ;;  %p2860_p11 = scmp.ge.s32.totalorder %s2859_s25, %s4595_s22  ;;  %v2803_v8 = vld [vmem:[%s3551_s24 + $0x20] sm:$0xff]  ;;  %v2805_v43 = vld [vmem:[%s3551_s24 + $0x28] sm:$0xff]  ;;  %p2788_p12 = scmp.ge.s32.totalorder %s2789_s2, %s4595_s22 }
 0x62a   : >> { %2798 = vst [vmem:[%s3547_s21 + $0x8] sm:$0xff] %v2797_v15  ;;  %v2807_v29 = vld [vmem:[%s3551_s24 + $0x30] sm:$0xff]  ;;  %v2809_v35 = vld [vmem:[%s3551_s24 + $0x38] sm:$0xff]  ;;  %v2811_v51 = vld [vmem:[%s3551_s24 + $0x40] sm:$0xff] }
 0x62b   : >> { %2800 = vst [vmem:[%s3547_s21 + $0x10] sm:$0xff] %v2799_v9  ;;  %s4782_s25 = smov (%p2860_p11, %s2859_s25), 0  ;;  %v2813_v32 = vld [vmem:[%s3551_s24 + $0x48] sm:$0xff]  ;;  %v2815_v14 = vld [vmem:[%s3551_s24 + $0x50] sm:$0xff]  ;;  %v2817_v63 = vld [vmem:[%s3551_s24 + $0x58] sm:$0xff] }
 0x62c   : >> { %2802 = vst [vmem:[%s3547_s21 + $0x18] sm:$0xff] %v2801_v11  ;;  %s3303_s3 = sshll.u32 %s4782_s25, 8  ;;  %v2819_v16 = vld [vmem:[%s3551_s24 + $0x60] sm:$0xff]  ;;  %v2821_v40 = vld [vmem:[%s3551_s24 + $0x68] sm:$0xff]  ;;  %v2823_v19 = vld [vmem:[%s3551_s24 + $0x70] sm:$0xff]  ;;  %s4775_s29 = smov %s4782_s25 }
 0x62d   : >> { %2804 = vst [vmem:[%s3547_s21 + $0x20] sm:$0xff] %v2803_v8  ;;  %s4638_s19 = scalar_lea.vmem %s4471_s20, %s3303_s3 [#allocation2]   ;;  %s4641_s30 = scalar_lea.vmem %s4589_s1, %s3303_s3   ;;  %v2825_v28 = vld [vmem:[%s3551_s24 + $0x78] sm:$0xff]  ;;  %v2827_v22 = vld [vmem:[%s3551_s24 + $0x80] sm:$0xff]  ;;  %v2829_v21 = vld [vmem:[%s3551_s24 + $0x88] sm:$0xff] }
 0x62e   : >> { %2806 = vst [vmem:[%s3547_s21 + $0x28] sm:$0xff] %v2805_v43  ;;  %v2831_v31 = vld [vmem:[%s3551_s24 + $0x90] sm:$0xff]  ;;  %v2833_v34 = vld [vmem:[%s3551_s24 + $0x98] sm:$0xff]  ;;  %v2835_v38 = vld [vmem:[%s3551_s24 + $0xa0] sm:$0xff] }
 0x62f   : >> { %2808 = vst [vmem:[%s3547_s21 + $0x30] sm:$0xff] %v2807_v29  ;;  %v2837_v45 = vld [vmem:[%s3551_s24 + $0xa8] sm:$0xff]  ;;  %v2839_v42 = vld [vmem:[%s3551_s24 + $0xb0] sm:$0xff]  ;;  %v2841_v33 = vld [vmem:[%s3551_s24 + $0xb8] sm:$0xff] }
 0x630   : >> { %2810 = vst [vmem:[%s3547_s21 + $0x38] sm:$0xff] %v2809_v35  ;;  %v2843_v41 = vld [vmem:[%s3551_s24 + $0xc0] sm:$0xff]  ;;  %v2845_v49 = vld [vmem:[%s3551_s24 + $0xc8] sm:$0xff]  ;;  %v2847_v61 = vld [vmem:[%s3551_s24 + $0xd0] sm:$0xff] }
 0x631   : >> { %2812 = vst [vmem:[%s3547_s21 + $0x40] sm:$0xff] %v2811_v51  ;;  %v2849_v39 = vld [vmem:[%s3551_s24 + $0xd8] sm:$0xff]  ;;  %v2851_v46 = vld [vmem:[%s3551_s24 + $0xe0] sm:$0xff]  ;;  %v2853_v36 = vld [vmem:[%s3551_s24 + $0xe8] sm:$0xff] }
 0x632   : >> { %2814 = vst [vmem:[%s3547_s21 + $0x48] sm:$0xff] %v2813_v32  ;;  %v2855_v53 = vld [vmem:[%s3551_s24 + $0xf0] sm:$0xff]  ;;  %v2857_v18 = vld [vmem:[%s3551_s24 + $0xf8] sm:$0xff]  ;;  %s4774_s24 = smov %s4638_s19 }
 0x633   : >> { %2816 = vst [vmem:[%s3547_s21 + $0x50] sm:$0xff] %v2815_v14 }
 0x634   : >> { %2818 = vst [vmem:[%s3547_s21 + $0x58] sm:$0xff] %v2817_v63 }
 0x635   : >> { %2820 = vst [vmem:[%s3547_s21 + $0x60] sm:$0xff] %v2819_v16 }
 0x636   : >> { %2822 = vst [vmem:[%s3547_s21 + $0x68] sm:$0xff] %v2821_v40 }
 0x637   : >> { %2824 = vst [vmem:[%s3547_s21 + $0x70] sm:$0xff] %v2823_v19 }
 0x638   : >> { %2826 = vst [vmem:[%s3547_s21 + $0x78] sm:$0xff] %v2825_v28 }
 0x639   : >> { %2828 = vst [vmem:[%s3547_s21 + $0x80] sm:$0xff] %v2827_v22 }
 0x63a   : >> { %2830 = vst [vmem:[%s3547_s21 + $0x88] sm:$0xff] %v2829_v21 }
 0x63b   : >> { %2832 = vst [vmem:[%s3547_s21 + $0x90] sm:$0xff] %v2831_v31 }
 0x63c   : >> { %2834 = vst [vmem:[%s3547_s21 + $0x98] sm:$0xff] %v2833_v34 }
 0x63d   : >> { %2836 = vst [vmem:[%s3547_s21 + $0xa0] sm:$0xff] %v2835_v38 }
 0x63e   : >> { %2838 = vst [vmem:[%s3547_s21 + $0xa8] sm:$0xff] %v2837_v45 }
 0x63f   : >> { %2840 = vst [vmem:[%s3547_s21 + $0xb0] sm:$0xff] %v2839_v42 }
 0x640   : >> { %2842 = vst [vmem:[%s3547_s21 + $0xb8] sm:$0xff] %v2841_v33 }
 0x641   : >> { %2844 = vst [vmem:[%s3547_s21 + $0xc0] sm:$0xff] %v2843_v41 }
 0x642   : >> { %2846 = vst [vmem:[%s3547_s21 + $0xc8] sm:$0xff] %v2845_v49 }
 0x643   : >> { %2848 = vst [vmem:[%s3547_s21 + $0xd0] sm:$0xff] %v2847_v61 }
 0x644   : >> { %2850 = vst [vmem:[%s3547_s21 + $0xd8] sm:$0xff] %v2849_v39  ;;  %2791 = sbr.rel (!%p2788_p12) target bundleno = 1576 (0x628), region = 186 }
 0x645   : >> { %2852 = vst [vmem:[%s3547_s21 + $0xe0] sm:$0xff] %v2851_v46 }
 0x646   : >> { %2854 = vst [vmem:[%s3547_s21 + $0xe8] sm:$0xff] %v2853_v36 }
 0x647   : >> { %2856 = vst [vmem:[%s3547_s21 + $0xf0] sm:$0xff] %v2855_v53 }
 0x648   : >> { %2858 = vst [vmem:[%s3547_s21 + $0xf8] sm:$0xff] %v2857_v18  ;;  %s4773_s21 = smov %s4641_s30 }
 0x649 PF: > { %s4706_s28 = sand.u32 31, %s4780_s0   ;;  %s3380_s3 = sshll.u32 %s4595_s22, 8 }
 0x64a   : > { %s2870_s4 = scalar_lea.vmem %s4471_s20, %s3380_s3 [#allocation2]   ;;  %s2872_s5 = scalar_lea.vmem %s4589_s1, %s3380_s3  }
 0x64b   : > { %p3308_p13 = scmp.le.s32.totalorder %s4706_s28, 0 }
 0x64c   : > { %s3561_s30 = smov (!%p3308_p13), %s2872_s5   ;;  %s3565_s19 = smov (!%p3308_p13), %s2870_s4  }
 0x64d   : > { %2963 = sbr.rel (%p3308_p13) target bundleno = 1626 (0x65a), region = 191  ;;  %s3569_s6 = smov (!%p3308_p13), 0  }
 0x64e   : > { %s3573_s25 = smov (!%p3308_p13), 0  }
 0x652 LB: >> { %v2882_v48 = vld [vmem:[%s3567_s19] sm:$0xff]  ;;  %s2884_s0 = sadd.s32 1, %s3571_s6  ;;  %s2876_s25 = sadd.s32 1, %s3575_s25   ;;  %s3575_s25 = sphi %s3573_s25, %s2876_s25   ;;  %s3571_s6 = sphi %s3569_s6, %s3570_s6   ;;  %s3567_s19 = sphi %s3565_s19, %s2889_s19   ;;  %s3563_s30 = sphi %s3561_s30, %s2890_s30  }
 0x653   : >> { %2883 = vst [vmem:[%s3563_s30] sm:$0xff] %v2882_v48  ;;  %p2885_p0 = scmp.ge.s32.totalorder %s2884_s0, %s4706_s28  ;;  %p2875_p1 = scmp.ge.s32.totalorder %s2876_s25, %s4706_s28 }
 0x655   : >> { %s4784_s0 = smov (%p2885_p0, %s2884_s0), 0  ;;  %2878 = sbr.rel (!%p2875_p1) target bundleno = 1618 (0x652), region = 197 }
 0x656   : >> { %s3309_s20 = sshll.u32 %s4784_s0, 3  ;;  %s3570_s6 = smov %s4784_s0  }
 0x657   : >> { %s2889_s19 = scalar_lea.vmem %s2870_s4, %s3309_s20 [#allocation2]   ;;  %s2890_s30 = scalar_lea.vmem %s2872_s5, %s3309_s20  }
 0x65a PF: > { %s4776_s20 = sld [smem:[#allocation4_spill]] }
 0x65b   : > { %s4777_s0 = sld [smem:[#allocation3_spill]] }
 0x65c   : > { %s4778_s30 = sld [smem:[#allocation5_spill]] }
 0x660   : > { %p26_p2 = scmp.ge.s32.totalorder %s4776_s20, 6  }
 0x662   :  { %28 = sbr.rel (!%p26_p2) target bundleno = 11 (0xb), region = 208 }

</bundles_post_ra>
